<compile_context>
chip_gen: v6e
topology: v6e:2x2x1
jax: 0.10.0
libtpu: 0.0.40
codegen_flags: <defaults>
</compile_context>

<pallas_src>
import functools

import jax
import jax.numpy as jnp
from jax import lax
from jax.experimental import pallas as pl
from jax.experimental.pallas import tpu as pltpu


def _round_up(v, m):
    return (v + m - 1) // m * m


def basic_block_kernel(x_ref, w1_ref, s1_ref, b1_ref, w2_ref, s2_ref, b2_ref,
                       o_ref, buf_ref, *, W, M, NB):
    """NB images per grid step.

    Layout: channels (padded to Cp, multiple of 16) on sublanes, H*W pixels
    (padded to Mp, multiple of 128) on lanes.
      x_ref  : (NB, Cp, Mp) f32          o_ref : (NB, Cp, Mp) f32
      w*     : (3, Cp, 3*Cp) bf16        s*/b* : (Cp, 1) f32 folded BN params
      buf_ref: (Cp, FL + Mp + W + 1) bf16 persistent halo buffer
               (left fringe FL = round_up(W+1, 128) so the center is aligned).
    """
    Cp = x_ref.shape[1]
    Mp = x_ref.shape[2]
    FR = W + 1                                   # needed fringe width
    FL = buf_ref.shape[1] - Mp - FR              # 128-aligned left fringe
    B0 = FL - FR                                 # base offset of the dy=0,dx=0 tap

    # Hoisted parameter loads (constant block index -> resident across steps).
    w1 = w1_ref[...]
    w2 = w2_ref[...]
    s1 = s1_ref[...]
    b1 = b1_ref[...]
    s2 = s2_ref[...]
    b2 = b2_ref[...]

    # Column-validity masks, built in-kernel (no extra DMA inputs).
    col = lax.broadcasted_iota(jnp.int32, (1, Mp), 1)
    wcol = col % W
    mask_l = (wcol >= 1).astype(jnp.float32)       # source column w-1 is valid
    mask_r = (wcol <= W - 2).astype(jnp.float32)   # source column w+1 is valid

    # Re-zero only the two halo fringes each step (tiny; megacore-safe).
    zfringe = jnp.zeros((Cp, FR), jnp.bfloat16)
    buf_ref[:, B0:B0 + FR] = zfringe
    buf_ref[:, FL + Mp:FL + Mp + FR] = zfringe

    def conv3x3(w):
        # 3x3 / pad=1 / stride=1 conv.  The three dy-taps of each dx column
        # are stacked on sublanes -> one (Cp, 3Cp) @ (3Cp, Mp) matmul per dx;
        # the left/right boundary masks are applied to the matmul outputs.
        outs = []
        for dx in range(3):
            taps = [buf_ref[:, B0 + dy * W + dx:B0 + dy * W + dx + Mp]
                    for dy in range(3)]
            rhs = jnp.concatenate(taps, axis=0)            # (3*Cp, Mp) bf16
            outs.append(jnp.dot(w[dx], rhs,
                                preferred_element_type=jnp.float32))
        return outs[1] + mask_l * outs[0] + mask_r * outs[2]

    for i in range(NB):                                    # small static unroll
        x = x_ref[i]                                       # (Cp, Mp) f32 residual
        buf_ref[:, FL:FL + Mp] = x.astype(jnp.bfloat16)    # single cast, aligned
        mid = conv3x3(w1)
        mid = jnp.maximum(mid * s1 + b1, 0.0)              # BN1 + ReLU (f32 VPU)
        if Mp != M:
            # Keep lane padding zero so conv2's "below image" reads stay zero.
            mid = mid * (col < M).astype(jnp.float32)
        # Dropout(p=0.9): identity at inference time.
        buf_ref[:, FL:FL + Mp] = mid.astype(jnp.bfloat16)  # bf16 conv2 input
        out = conv3x3(w2)
        out = out * s2 + b2                                # BN2 (folded)
        # Dropout(p=0.9): identity at inference time.
        out = jnp.maximum(out + x, 0.0)                    # residual add + ReLU
        o_ref[i] = out                                     # lane-dense store


def fold_bn(gamma, beta, mean, var, eps=1e-5):
    scale = gamma / jnp.sqrt(var + eps)
    return scale, beta - mean * scale


def _images_per_step(N, Cp, Mp):
    # Amortize the ~0.35us fixed per-grid-step cost when per-image work is small.
    if Cp * Mp * 4 >= (1 << 20):
        return 1
    nb = 1
    while nb < 4 and nb * 2 <= N:
        nb *= 2
    return nb


def basic_block(x_nchw, w1_oihw, bn1, w2_oihw, bn2, *, eps=1e-5):
    """Eval-mode BasicBlock. x_nchw: (N,C,H,W) f32; w*: (C,C,3,3) PyTorch OIHW."""
    N, C, H, W = x_nchw.shape
    M = H * W
    Cp = max(16, _round_up(C, 16))      # bf16 min tile is (16, 128)
    Mp = _round_up(M, 128)              # lane-dense, unmasked stores
    NB = _images_per_step(N, Cp, Mp)
    Np = _round_up(N, NB)
    FL = _round_up(W + 1, 128)          # aligned activation center in the buffer
    buf_w = FL + Mp + W + 1

    # NCHW -> (N, C, H*W) is a free reshape (pixels are the dense lane axis).
    x = x_nchw.reshape(N, C, M)
    if (Np, Cp, Mp) != (N, C, M):
        x = jnp.pad(x, ((0, Np - N), (0, Cp - C), (0, Mp - M)))

    def prep_w(w_oihw):
        # (Cout, Cin, ky, kx) -> (kx, Cout, ky*Cin): one (Cp, 3*Cp) LHS per dx
        # whose contraction axis is (ky-major, Cin-minor), matching the
        # sublane-stacked dy taps in the kernel.
        w = w_oihw
        if Cp != C:
            w = jnp.pad(w, ((0, Cp - C), (0, Cp - C), (0, 0), (0, 0)))
        w = jnp.transpose(w, (3, 0, 2, 1)).reshape(3, Cp, 3 * Cp)
        return w.astype(jnp.bfloat16)   # MXU operands in bf16

    def prep_bn(bn):
        s, b = fold_bn(*bn, eps=eps)
        if Cp != C:
            s = jnp.pad(s, (0, Cp - C))
            b = jnp.pad(b, (0, Cp - C))
        return (s.reshape(Cp, 1).astype(jnp.float32),
                b.reshape(Cp, 1).astype(jnp.float32))

    w1m = prep_w(w1_oihw)
    w2m = prep_w(w2_oihw)
    s1, b1 = prep_bn(bn1)
    s2, b2 = prep_bn(bn2)

    # Rough VMEM footprint: double-buffered pipelined blocks + scratch + live values.
    est = (2 * (2 * NB * Cp * Mp * 4 + 2 * 3 * Cp * 3 * Cp * 2 + 4 * Cp * 4)
           + Cp * buf_w * 2 + 10 * Cp * Mp * 4)
    params = dict(dimension_semantics=("parallel",))        # v7x megacore split
    if est > 12 * (1 << 20):
        params["vmem_limit_bytes"] = int(min(max(2 * est, 32 << 20), 96 << 20))

    kernel = functools.partial(basic_block_kernel, W=W, M=M, NB=NB)
    out = pl.pallas_call(
        kernel,
        out_shape=jax.ShapeDtypeStruct((Np, Cp, Mp), jnp.float32),
        grid=(Np // NB,),
        in_specs=[
            pl.BlockSpec((NB, Cp, Mp), lambda n: (n, 0, 0)),     # x (+ residual)
            pl.BlockSpec((3, Cp, 3 * Cp), lambda n: (0, 0, 0)),  # w1 (per-dx)
            pl.BlockSpec((Cp, 1), lambda n: (0, 0)),             # s1
            pl.BlockSpec((Cp, 1), lambda n: (0, 0)),             # b1
            pl.BlockSpec((3, Cp, 3 * Cp), lambda n: (0, 0, 0)),  # w2 (per-dx)
            pl.BlockSpec((Cp, 1), lambda n: (0, 0)),             # s2
            pl.BlockSpec((Cp, 1), lambda n: (0, 0)),             # b2
        ],
        out_specs=pl.BlockSpec((NB, Cp, Mp), lambda n: (n, 0, 0)),
        scratch_shapes=[pltpu.VMEM((Cp, buf_w), jnp.bfloat16)],  # halo buffer
        compiler_params=pltpu.CompilerParams(**params),
    )(x, w1m, s1, b1, w2m, s2, b2)

    return out[:N, :C, :M].reshape(N, C, H, W)


def reference(x, w1_oihw, bn1, w2_oihw, bn2, eps=1e-5):
    dn = ('NCHW', 'OIHW', 'NCHW')
    hp = lax.Precision.HIGHEST
    s1, b1 = fold_bn(*bn1, eps=eps)
    s2, b2 = fold_bn(*bn2, eps=eps)
    o = lax.conv_general_dilated(x, w1_oihw, (1, 1), 'SAME',
                                 dimension_numbers=dn, precision=hp)
    o = jnp.maximum(o * s1[None, :, None, None] + b1[None, :, None, None], 0.0)
    o = lax.conv_general_dilated(o, w2_oihw, (1, 1), 'SAME',
                                 dimension_numbers=dn, precision=hp)
    o = o * s2[None, :, None, None] + b2[None, :, None, None]
    return jnp.maximum(o + x, 0.0)


def _make_case(key, N, C, H, W):
    ks = jax.random.split(key, 11)
    x = jax.random.normal(ks[0], (N, C, H, W), jnp.float32)
    w1 = jax.random.normal(ks[1], (C, C, 3, 3), jnp.float32) * 0.1   # PyTorch OIHW
    w2 = jax.random.normal(ks[2], (C, C, 3, 3), jnp.float32) * 0.1

    def bn(i):
        return (jax.random.normal(ks[3 + 4 * i], (C,)) * 0.1 + 1.0,   # gamma
                jax.random.normal(ks[4 + 4 * i], (C,)) * 0.1,          # beta
                jax.random.normal(ks[5 + 4 * i], (C,)) * 0.1,          # running_mean
                jnp.abs(jax.random.normal(ks[6 + 4 * i], (C,))) * 0.1 + 0.9)  # var

    return x, w1, bn(0), w2, bn(1)


if __name__ == "__main__":
    key = jax.random.PRNGKey(0)
    k1, k2 = jax.random.split(key)

    # Primary case: inplanes = planes = 4, stride = 1 (constructor defaults).
    case1 = _make_case(k1, 2, 4, 16, 16)
    out1 = jax.block_until_ready(basic_block(*case1))
    ref1 = jax.block_until_ready(reference(*case1))
    assert out1.shape == case1[0].shape
    err1 = float(jnp.max(jnp.abs(out1 - ref1)))
    # Kernel uses bf16 MXU operands with f32 accumulation; reference is f32.
    assert jnp.allclose(out1, ref1, atol=5e-2, rtol=5e-2), err1

    # Second tiny case exercising lane padding (H*W=100 -> 128) and batch
    # padding (N=3 with 2 images per grid step).
    case2 = _make_case(k2, 3, 3, 10, 10)
    out2 = jax.block_until_ready(basic_block(*case2))
    ref2 = jax.block_until_ready(reference(*case2))
    assert out2.shape == case2[0].shape
    err2 = float(jnp.max(jnp.abs(out2 - ref2)))
    assert jnp.allclose(out2, ref2, atol=5e-2, rtol=5e-2), err2

    print("KERNEL_OK")
</pallas_src>

<mosaic_0001>
module attributes {stable_mosaic.version = 11 : i64} {
  func.func @basic_block_kernel(%arg0: i32, %arg1: memref<2x16x256xf32, #tpu.memory_space<vmem>>, %arg2: memref<3x16x48xbf16, #tpu.memory_space<vmem>>, %arg3: memref<16x1xf32, #tpu.memory_space<vmem>>, %arg4: memref<16x1xf32, #tpu.memory_space<vmem>>, %arg5: memref<3x16x48xbf16, #tpu.memory_space<vmem>>, %arg6: memref<16x1xf32, #tpu.memory_space<vmem>>, %arg7: memref<16x1xf32, #tpu.memory_space<vmem>>, %arg8: memref<2x16x256xf32, #tpu.memory_space<vmem>>, %arg9: memref<16x401xbf16, #tpu.memory_space<vmem>>) attributes {dimension_semantics = [#tpu.dimension_semantics<parallel>], iteration_bounds = array<i64: 1>, scalar_prefetch = 0 : i64, scratch_operands = 1 : i64, tpu.core_type = #tpu.core_type<tc>, window_params = [{transform_indices = @transform_0, window_bounds = array<i64: 2, 16, 256>}, {pipeline_mode = #tpu.pipeline_mode<synchronous>, transform_indices = @transform_1, window_bounds = array<i64: 3, 16, 48>}, {pipeline_mode = #tpu.pipeline_mode<synchronous>, transform_indices = @transform_2, window_bounds = array<i64: 16, 1>}, {pipeline_mode = #tpu.pipeline_mode<synchronous>, transform_indices = @transform_3, window_bounds = array<i64: 16, 1>}, {pipeline_mode = #tpu.pipeline_mode<synchronous>, transform_indices = @transform_4, window_bounds = array<i64: 3, 16, 48>}, {pipeline_mode = #tpu.pipeline_mode<synchronous>, transform_indices = @transform_5, window_bounds = array<i64: 16, 1>}, {pipeline_mode = #tpu.pipeline_mode<synchronous>, transform_indices = @transform_6, window_bounds = array<i64: 16, 1>}, {transform_indices = @transform_7, window_bounds = array<i64: 2, 16, 256>}]} {
    %c0 = arith.constant 0 : index
    %c0_0 = arith.constant 0 : index
    %c0_1 = arith.constant 0 : index
    %0 = vector.load %arg2[%c0, %c0_0, %c0_1] : memref<3x16x48xbf16, #tpu.memory_space<vmem>>, vector<3x16x48xbf16>
    %c0_2 = arith.constant 0 : index
    %c0_3 = arith.constant 0 : index
    %c0_4 = arith.constant 0 : index
    %1 = vector.load %arg5[%c0_2, %c0_3, %c0_4] : memref<3x16x48xbf16, #tpu.memory_space<vmem>>, vector<3x16x48xbf16>
    %c0_5 = arith.constant 0 : index
    %c0_6 = arith.constant 0 : index
    %2 = vector.load %arg3[%c0_5, %c0_6] : memref<16x1xf32, #tpu.memory_space<vmem>>, vector<16x1xf32>
    %c0_7 = arith.constant 0 : index
    %c0_8 = arith.constant 0 : index
    %3 = vector.load %arg4[%c0_7, %c0_8] : memref<16x1xf32, #tpu.memory_space<vmem>>, vector<16x1xf32>
    %c0_9 = arith.constant 0 : index
    %c0_10 = arith.constant 0 : index
    %4 = vector.load %arg6[%c0_9, %c0_10] : memref<16x1xf32, #tpu.memory_space<vmem>>, vector<16x1xf32>
    %c0_11 = arith.constant 0 : index
    %c0_12 = arith.constant 0 : index
    %5 = vector.load %arg7[%c0_11, %c0_12] : memref<16x1xf32, #tpu.memory_space<vmem>>, vector<16x1xf32>
    %6 = tpu.iota {dimensions = array<i32: 1>} : vector<1x256xi32>
    %c16_i32 = arith.constant 16 : i32
    %c0_i32 = arith.constant 0 : i32
    %7 = arith.cmpi eq, %c16_i32, %c0_i32 : i32
    %c1_i32 = arith.constant 1 : i32
    %8 = arith.select %7, %c1_i32, %c16_i32 : i32
    %9 = vector.broadcast %8 : i32 to vector<1x256xi32>
    %10 = arith.remsi %6, %9 : vector<1x256xi32>
    %c0_i32_13 = arith.constant 0 : i32
    %11 = vector.broadcast %c0_i32_13 : i32 to vector<1x256xi32>
    %12 = arith.cmpi ne, %10, %11 : vector<1x256xi32>
    %c0_i32_14 = arith.constant 0 : i32
    %13 = vector.broadcast %c0_i32_14 : i32 to vector<1x256xi32>
    %14 = arith.cmpi slt, %10, %13 : vector<1x256xi32>
    %c0_i32_15 = arith.constant 0 : i32
    %15 = arith.cmpi slt, %8, %c0_i32_15 : i32
    %16 = vector.broadcast %15 : i1 to vector<1x256xi1>
    %17 = vector.broadcast %16 : vector<1x256xi1> to vector<1x256xi1>
    %18 = arith.xori %14, %17 : vector<1x256xi1>
    %19 = arith.andi %18, %12 : vector<1x256xi1>
    %20 = vector.broadcast %8 : i32 to vector<1x256xi32>
    %21 = arith.addi %10, %20 : vector<1x256xi32>
    %22 = arith.select %19, %21, %10 : vector<1x256xi1>, vector<1x256xi32>
    %c1_i32_16 = arith.constant 1 : i32
    %23 = vector.broadcast %c1_i32_16 : i32 to vector<1x256xi32>
    %24 = arith.cmpi sge, %22, %23 : vector<1x256xi32>
    %25 = arith.extui %24 : vector<1x256xi1> to vector<1x256xi32>
    %26 = arith.sitofp %25 : vector<1x256xi32> to vector<1x256xf32>
    %c14_i32 = arith.constant 14 : i32
    %27 = vector.broadcast %c14_i32 : i32 to vector<1x256xi32>
    %28 = arith.cmpi sle, %22, %27 : vector<1x256xi32>
    %29 = arith.extui %28 : vector<1x256xi1> to vector<1x256xi32>
    %30 = arith.sitofp %29 : vector<1x256xi32> to vector<1x256xf32>
    %cst = arith.constant 0.000000e+00 : bf16
    %31 = vector.broadcast %cst : bf16 to vector<16x17xbf16>
    %c0_17 = arith.constant 0 : index
    %c111 = arith.constant 111 : index
    %32 = vector.load %arg9[%c0_17, %c111] : memref<16x401xbf16, #tpu.memory_space<vmem>>, vector<16x17xbf16>
    tpu.vector_store %arg9[%c0_17, %c111], %31 {strides = array<i32>} : memref<16x401xbf16, #tpu.memory_space<vmem>>, vector<16x17xbf16>,
    %c0_18 = arith.constant 0 : index
    %c384 = arith.constant 384 : index
    %33 = vector.load %arg9[%c0_18, %c384] : memref<16x401xbf16, #tpu.memory_space<vmem>>, vector<16x17xbf16>
    tpu.vector_store %arg9[%c0_18, %c384], %31 {strides = array<i32>} : memref<16x401xbf16, #tpu.memory_space<vmem>>, vector<16x17xbf16>,
    %c0_19 = arith.constant 0 : index
    %c0_20 = arith.constant 0 : index
    %c0_21 = arith.constant 0 : index
    %34 = vector.load %arg1[%c0_19, %c0_20, %c0_21] : memref<2x16x256xf32, #tpu.memory_space<vmem>>, vector<1x16x256xf32>
    %35 = vector.shape_cast %34 : vector<1x16x256xf32> to vector<16x256xf32>
    %36 = arith.truncf %35 : vector<16x256xf32> to vector<16x256xbf16>
    %c0_22 = arith.constant 0 : index
    %c128 = arith.constant 128 : index
    %37 = vector.load %arg9[%c0_22, %c128] : memref<16x401xbf16, #tpu.memory_space<vmem>>, vector<16x256xbf16>
    tpu.vector_store %arg9[%c0_22, %c128], %36 {strides = array<i32>} : memref<16x401xbf16, #tpu.memory_space<vmem>>, vector<16x256xbf16>,
    %c0_23 = arith.constant 0 : index
    %c111_24 = arith.constant 111 : index
    %38 = vector.load %arg9[%c0_23, %c111_24] : memref<16x401xbf16, #tpu.memory_space<vmem>>, vector<16x256xbf16>
    %c0_25 = arith.constant 0 : index
    %c127 = arith.constant 127 : index
    %39 = vector.load %arg9[%c0_25, %c127] : memref<16x401xbf16, #tpu.memory_space<vmem>>, vector<16x256xbf16>
    %c0_26 = arith.constant 0 : index
    %c143 = arith.constant 143 : index
    %40 = vector.load %arg9[%c0_26, %c143] : memref<16x401xbf16, #tpu.memory_space<vmem>>, vector<16x256xbf16>
    %41 = tpu.concatenate %38, %39, %40 in 0 : vector<16x256xbf16>, vector<16x256xbf16>, vector<16x256xbf16> -> vector<48x256xbf16>
    %42 = vector.extract_strided_slice %0 {offsets = [0, 0, 0], sizes = [1, 16, 48], strides = [1, 1, 1]} : vector<3x16x48xbf16> to vector<1x16x48xbf16>
    %43 = vector.shape_cast %42 : vector<1x16x48xbf16> to vector<16x48xbf16>
    %cst_27 = arith.constant dense<0.000000e+00> : vector<16x256xf32>
    %44 = tpu.matmul %43, %41, %cst_27 {dimension_numbers = #tpu.dot_dimension_numbers<[1], [0], [0], [1], [0, 0, 1, 1], [], []>} : vector<16x48xbf16>, vector<48x256xbf16>, vector<16x256xf32> -> vector<16x256xf32>
    %c0_28 = arith.constant 0 : index
    %c112 = arith.constant 112 : index
    %45 = vector.load %arg9[%c0_28, %c112] : memref<16x401xbf16, #tpu.memory_space<vmem>>, vector<16x256xbf16>
    %c0_29 = arith.constant 0 : index
    %c128_30 = arith.constant 128 : index
    %46 = vector.load %arg9[%c0_29, %c128_30] : memref<16x401xbf16, #tpu.memory_space<vmem>>, vector<16x256xbf16>
    %c0_31 = arith.constant 0 : index
    %c144 = arith.constant 144 : index
    %47 = vector.load %arg9[%c0_31, %c144] : memref<16x401xbf16, #tpu.memory_space<vmem>>, vector<16x256xbf16>
    %48 = tpu.concatenate %45, %46, %47 in 0 : vector<16x256xbf16>, vector<16x256xbf16>, vector<16x256xbf16> -> vector<48x256xbf16>
    %49 = vector.extract_strided_slice %0 {offsets = [1, 0, 0], sizes = [1, 16, 48], strides = [1, 1, 1]} : vector<3x16x48xbf16> to vector<1x16x48xbf16>
    %50 = vector.shape_cast %49 : vector<1x16x48xbf16> to vector<16x48xbf16>
    %cst_32 = arith.constant dense<0.000000e+00> : vector<16x256xf32>
    %51 = tpu.matmul %50, %48, %cst_32 {dimension_numbers = #tpu.dot_dimension_numbers<[1], [0], [0], [1], [0, 0, 1, 1], [], []>} : vector<16x48xbf16>, vector<48x256xbf16>, vector<16x256xf32> -> vector<16x256xf32>
    %c0_33 = arith.constant 0 : index
    %c113 = arith.constant 113 : index
    %52 = vector.load %arg9[%c0_33, %c113] : memref<16x401xbf16, #tpu.memory_space<vmem>>, vector<16x256xbf16>
    %c0_34 = arith.constant 0 : index
    %c129 = arith.constant 129 : index
    %53 = vector.load %arg9[%c0_34, %c129] : memref<16x401xbf16, #tpu.memory_space<vmem>>, vector<16x256xbf16>
    %c0_35 = arith.constant 0 : index
    %c145 = arith.constant 145 : index
    %54 = vector.load %arg9[%c0_35, %c145] : memref<16x401xbf16, #tpu.memory_space<vmem>>, vector<16x256xbf16>
    %55 = tpu.concatenate %52, %53, %54 in 0 : vector<16x256xbf16>, vector<16x256xbf16>, vector<16x256xbf16> -> vector<48x256xbf16>
    %56 = vector.extract_strided_slice %0 {offsets = [2, 0, 0], sizes = [1, 16, 48], strides = [1, 1, 1]} : vector<3x16x48xbf16> to vector<1x16x48xbf16>
    %57 = vector.shape_cast %56 : vector<1x16x48xbf16> to vector<16x48xbf16>
    %cst_36 = arith.constant dense<0.000000e+00> : vector<16x256xf32>
    %58 = tpu.matmul %57, %55, %cst_36 {dimension_numbers = #tpu.dot_dimension_numbers<[1], [0], [0], [1], [0, 0, 1, 1], [], []>} : vector<16x48xbf16>, vector<48x256xbf16>, vector<16x256xf32> -> vector<16x256xf32>
    %59 = vector.broadcast %26 : vector<1x256xf32> to vector<16x256xf32>
    %60 = arith.mulf %59, %44 : vector<16x256xf32>
    %61 = arith.addf %51, %60 : vector<16x256xf32>
    %62 = vector.broadcast %30 : vector<1x256xf32> to vector<16x256xf32>
    %63 = arith.mulf %62, %58 : vector<16x256xf32>
    %64 = arith.addf %61, %63 : vector<16x256xf32>
    %65 = vector.broadcast %2 : vector<16x1xf32> to vector<16x256xf32>
    %66 = arith.mulf %64, %65 : vector<16x256xf32>
    %67 = vector.broadcast %3 : vector<16x1xf32> to vector<16x256xf32>
    %68 = arith.addf %66, %67 : vector<16x256xf32>
    %cst_37 = arith.constant 0.000000e+00 : f32
    %69 = vector.broadcast %cst_37 : f32 to vector<16x256xf32>
    %70 = arith.maximumf %68, %69 : vector<16x256xf32>
    %71 = arith.truncf %70 : vector<16x256xf32> to vector<16x256xbf16>
    %c0_38 = arith.constant 0 : index
    %c128_39 = arith.constant 128 : index
    %72 = vector.load %arg9[%c0_38, %c128_39] : memref<16x401xbf16, #tpu.memory_space<vmem>>, vector<16x256xbf16>
    tpu.vector_store %arg9[%c0_38, %c128_39], %71 {strides = array<i32>} : memref<16x401xbf16, #tpu.memory_space<vmem>>, vector<16x256xbf16>,
    %c0_40 = arith.constant 0 : index
    %c111_41 = arith.constant 111 : index
    %73 = vector.load %arg9[%c0_40, %c111_41] : memref<16x401xbf16, #tpu.memory_space<vmem>>, vector<16x256xbf16>
    %c0_42 = arith.constant 0 : index
    %c127_43 = arith.constant 127 : index
    %74 = vector.load %arg9[%c0_42, %c127_43] : memref<16x401xbf16, #tpu.memory_space<vmem>>, vector<16x256xbf16>
    %c0_44 = arith.constant 0 : index
    %c143_45 = arith.constant 143 : index
    %75 = vector.load %arg9[%c0_44, %c143_45] : memref<16x401xbf16, #tpu.memory_space<vmem>>, vector<16x256xbf16>
    %76 = tpu.concatenate %73, %74, %75 in 0 : vector<16x256xbf16>, vector<16x256xbf16>, vector<16x256xbf16> -> vector<48x256xbf16>
    %77 = vector.extract_strided_slice %1 {offsets = [0, 0, 0], sizes = [1, 16, 48], strides = [1, 1, 1]} : vector<3x16x48xbf16> to vector<1x16x48xbf16>
    %78 = vector.shape_cast %77 : vector<1x16x48xbf16> to vector<16x48xbf16>
    %cst_46 = arith.constant dense<0.000000e+00> : vector<16x256xf32>
    %79 = tpu.matmul %78, %76, %cst_46 {dimension_numbers = #tpu.dot_dimension_numbers<[1], [0], [0], [1], [0, 0, 1, 1], [], []>} : vector<16x48xbf16>, vector<48x256xbf16>, vector<16x256xf32> -> vector<16x256xf32>
    %c0_47 = arith.constant 0 : index
    %c112_48 = arith.constant 112 : index
    %80 = vector.load %arg9[%c0_47, %c112_48] : memref<16x401xbf16, #tpu.memory_space<vmem>>, vector<16x256xbf16>
    %c0_49 = arith.constant 0 : index
    %c128_50 = arith.constant 128 : index
    %81 = vector.load %arg9[%c0_49, %c128_50] : memref<16x401xbf16, #tpu.memory_space<vmem>>, vector<16x256xbf16>
    %c0_51 = arith.constant 0 : index
    %c144_52 = arith.constant 144 : index
    %82 = vector.load %arg9[%c0_51, %c144_52] : memref<16x401xbf16, #tpu.memory_space<vmem>>, vector<16x256xbf16>
    %83 = tpu.concatenate %80, %81, %82 in 0 : vector<16x256xbf16>, vector<16x256xbf16>, vector<16x256xbf16> -> vector<48x256xbf16>
    %84 = vector.extract_strided_slice %1 {offsets = [1, 0, 0], sizes = [1, 16, 48], strides = [1, 1, 1]} : vector<3x16x48xbf16> to vector<1x16x48xbf16>
    %85 = vector.shape_cast %84 : vector<1x16x48xbf16> to vector<16x48xbf16>
    %cst_53 = arith.constant dense<0.000000e+00> : vector<16x256xf32>
    %86 = tpu.matmul %85, %83, %cst_53 {dimension_numbers = #tpu.dot_dimension_numbers<[1], [0], [0], [1], [0, 0, 1, 1], [], []>} : vector<16x48xbf16>, vector<48x256xbf16>, vector<16x256xf32> -> vector<16x256xf32>
    %c0_54 = arith.constant 0 : index
    %c113_55 = arith.constant 113 : index
    %87 = vector.load %arg9[%c0_54, %c113_55] : memref<16x401xbf16, #tpu.memory_space<vmem>>, vector<16x256xbf16>
    %c0_56 = arith.constant 0 : index
    %c129_57 = arith.constant 129 : index
    %88 = vector.load %arg9[%c0_56, %c129_57] : memref<16x401xbf16, #tpu.memory_space<vmem>>, vector<16x256xbf16>
    %c0_58 = arith.constant 0 : index
    %c145_59 = arith.constant 145 : index
    %89 = vector.load %arg9[%c0_58, %c145_59] : memref<16x401xbf16, #tpu.memory_space<vmem>>, vector<16x256xbf16>
    %90 = tpu.concatenate %87, %88, %89 in 0 : vector<16x256xbf16>, vector<16x256xbf16>, vector<16x256xbf16> -> vector<48x256xbf16>
    %91 = vector.extract_strided_slice %1 {offsets = [2, 0, 0], sizes = [1, 16, 48], strides = [1, 1, 1]} : vector<3x16x48xbf16> to vector<1x16x48xbf16>
    %92 = vector.shape_cast %91 : vector<1x16x48xbf16> to vector<16x48xbf16>
    %cst_60 = arith.constant dense<0.000000e+00> : vector<16x256xf32>
    %93 = tpu.matmul %92, %90, %cst_60 {dimension_numbers = #tpu.dot_dimension_numbers<[1], [0], [0], [1], [0, 0, 1, 1], [], []>} : vector<16x48xbf16>, vector<48x256xbf16>, vector<16x256xf32> -> vector<16x256xf32>
    %94 = vector.broadcast %26 : vector<1x256xf32> to vector<16x256xf32>
    %95 = arith.mulf %94, %79 : vector<16x256xf32>
    %96 = arith.addf %86, %95 : vector<16x256xf32>
    %97 = vector.broadcast %30 : vector<1x256xf32> to vector<16x256xf32>
    %98 = arith.mulf %97, %93 : vector<16x256xf32>
    %99 = arith.addf %96, %98 : vector<16x256xf32>
    %100 = vector.broadcast %4 : vector<16x1xf32> to vector<16x256xf32>
    %101 = arith.mulf %99, %100 : vector<16x256xf32>
    %102 = vector.broadcast %5 : vector<16x1xf32> to vector<16x256xf32>
    %103 = arith.addf %101, %102 : vector<16x256xf32>
    %104 = arith.addf %103, %35 : vector<16x256xf32>
    %cst_61 = arith.constant 0.000000e+00 : f32
    %105 = vector.broadcast %cst_61 : f32 to vector<16x256xf32>
    %106 = arith.maximumf %104, %105 : vector<16x256xf32>
    %c0_62 = arith.constant 0 : index
    %c0_63 = arith.constant 0 : index
    %c0_64 = arith.constant 0 : index
    %107 = vector.load %arg8[%c0_62, %c0_63, %c0_64] : memref<2x16x256xf32, #tpu.memory_space<vmem>>, vector<1x16x256xf32>
    %108 = vector.shape_cast %107 : vector<1x16x256xf32> to vector<16x256xf32>
    %109 = vector.shape_cast %106 : vector<16x256xf32> to vector<1x16x256xf32>
    tpu.vector_store %arg8[%c0_62, %c0_63, %c0_64], %109 {strides = array<i32>} : memref<2x16x256xf32, #tpu.memory_space<vmem>>, vector<1x16x256xf32>,
    %c1 = arith.constant 1 : index
    %c0_65 = arith.constant 0 : index
    %c0_66 = arith.constant 0 : index
    %110 = vector.load %arg1[%c1, %c0_65, %c0_66] : memref<2x16x256xf32, #tpu.memory_space<vmem>>, vector<1x16x256xf32>
    %111 = vector.shape_cast %110 : vector<1x16x256xf32> to vector<16x256xf32>
    %112 = arith.truncf %111 : vector<16x256xf32> to vector<16x256xbf16>
    %c0_67 = arith.constant 0 : index
    %c128_68 = arith.constant 128 : index
    %113 = vector.load %arg9[%c0_67, %c128_68] : memref<16x401xbf16, #tpu.memory_space<vmem>>, vector<16x256xbf16>
    tpu.vector_store %arg9[%c0_67, %c128_68], %112 {strides = array<i32>} : memref<16x401xbf16, #tpu.memory_space<vmem>>, vector<16x256xbf16>,
    %c0_69 = arith.constant 0 : index
    %c111_70 = arith.constant 111 : index
    %114 = vector.load %arg9[%c0_69, %c111_70] : memref<16x401xbf16, #tpu.memory_space<vmem>>, vector<16x256xbf16>
    %c0_71 = arith.constant 0 : index
    %c127_72 = arith.constant 127 : index
    %115 = vector.load %arg9[%c0_71, %c127_72] : memref<16x401xbf16, #tpu.memory_space<vmem>>, vector<16x256xbf16>
    %c0_73 = arith.constant 0 : index
    %c143_74 = arith.constant 143 : index
    %116 = vector.load %arg9[%c0_73, %c143_74] : memref<16x401xbf16, #tpu.memory_space<vmem>>, vector<16x256xbf16>
    %117 = tpu.concatenate %114, %115, %116 in 0 : vector<16x256xbf16>, vector<16x256xbf16>, vector<16x256xbf16> -> vector<48x256xbf16>
    %118 = vector.extract_strided_slice %0 {offsets = [0, 0, 0], sizes = [1, 16, 48], strides = [1, 1, 1]} : vector<3x16x48xbf16> to vector<1x16x48xbf16>
    %119 = vector.shape_cast %118 : vector<1x16x48xbf16> to vector<16x48xbf16>
    %cst_75 = arith.constant dense<0.000000e+00> : vector<16x256xf32>
    %120 = tpu.matmul %119, %117, %cst_75 {dimension_numbers = #tpu.dot_dimension_numbers<[1], [0], [0], [1], [0, 0, 1, 1], [], []>} : vector<16x48xbf16>, vector<48x256xbf16>, vector<16x256xf32> -> vector<16x256xf32>
    %c0_76 = arith.constant 0 : index
    %c112_77 = arith.constant 112 : index
    %121 = vector.load %arg9[%c0_76, %c112_77] : memref<16x401xbf16, #tpu.memory_space<vmem>>, vector<16x256xbf16>
    %c0_78 = arith.constant 0 : index
    %c128_79 = arith.constant 128 : index
    %122 = vector.load %arg9[%c0_78, %c128_79] : memref<16x401xbf16, #tpu.memory_space<vmem>>, vector<16x256xbf16>
    %c0_80 = arith.constant 0 : index
    %c144_81 = arith.constant 144 : index
    %123 = vector.load %arg9[%c0_80, %c144_81] : memref<16x401xbf16, #tpu.memory_space<vmem>>, vector<16x256xbf16>
    %124 = tpu.concatenate %121, %122, %123 in 0 : vector<16x256xbf16>, vector<16x256xbf16>, vector<16x256xbf16> -> vector<48x256xbf16>
    %125 = vector.extract_strided_slice %0 {offsets = [1, 0, 0], sizes = [1, 16, 48], strides = [1, 1, 1]} : vector<3x16x48xbf16> to vector<1x16x48xbf16>
    %126 = vector.shape_cast %125 : vector<1x16x48xbf16> to vector<16x48xbf16>
    %cst_82 = arith.constant dense<0.000000e+00> : vector<16x256xf32>
    %127 = tpu.matmul %126, %124, %cst_82 {dimension_numbers = #tpu.dot_dimension_numbers<[1], [0], [0], [1], [0, 0, 1, 1], [], []>} : vector<16x48xbf16>, vector<48x256xbf16>, vector<16x256xf32> -> vector<16x256xf32>
    %c0_83 = arith.constant 0 : index
    %c113_84 = arith.constant 113 : index
    %128 = vector.load %arg9[%c0_83, %c113_84] : memref<16x401xbf16, #tpu.memory_space<vmem>>, vector<16x256xbf16>
    %c0_85 = arith.constant 0 : index
    %c129_86 = arith.constant 129 : index
    %129 = vector.load %arg9[%c0_85, %c129_86] : memref<16x401xbf16, #tpu.memory_space<vmem>>, vector<16x256xbf16>
    %c0_87 = arith.constant 0 : index
    %c145_88 = arith.constant 145 : index
    %130 = vector.load %arg9[%c0_87, %c145_88] : memref<16x401xbf16, #tpu.memory_space<vmem>>, vector<16x256xbf16>
    %131 = tpu.concatenate %128, %129, %130 in 0 : vector<16x256xbf16>, vector<16x256xbf16>, vector<16x256xbf16> -> vector<48x256xbf16>
    %132 = vector.extract_strided_slice %0 {offsets = [2, 0, 0], sizes = [1, 16, 48], strides = [1, 1, 1]} : vector<3x16x48xbf16> to vector<1x16x48xbf16>
    %133 = vector.shape_cast %132 : vector<1x16x48xbf16> to vector<16x48xbf16>
    %cst_89 = arith.constant dense<0.000000e+00> : vector<16x256xf32>
    %134 = tpu.matmul %133, %131, %cst_89 {dimension_numbers = #tpu.dot_dimension_numbers<[1], [0], [0], [1], [0, 0, 1, 1], [], []>} : vector<16x48xbf16>, vector<48x256xbf16>, vector<16x256xf32> -> vector<16x256xf32>
    %135 = vector.broadcast %26 : vector<1x256xf32> to vector<16x256xf32>
    %136 = arith.mulf %135, %120 : vector<16x256xf32>
    %137 = arith.addf %127, %136 : vector<16x256xf32>
    %138 = vector.broadcast %30 : vector<1x256xf32> to vector<16x256xf32>
    %139 = arith.mulf %138, %134 : vector<16x256xf32>
    %140 = arith.addf %137, %139 : vector<16x256xf32>
    %141 = vector.broadcast %2 : vector<16x1xf32> to vector<16x256xf32>
    %142 = arith.mulf %140, %141 : vector<16x256xf32>
    %143 = vector.broadcast %3 : vector<16x1xf32> to vector<16x256xf32>
    %144 = arith.addf %142, %143 : vector<16x256xf32>
    %cst_90 = arith.constant 0.000000e+00 : f32
    %145 = vector.broadcast %cst_90 : f32 to vector<16x256xf32>
    %146 = arith.maximumf %144, %145 : vector<16x256xf32>
    %147 = arith.truncf %146 : vector<16x256xf32> to vector<16x256xbf16>
    %c0_91 = arith.constant 0 : index
    %c128_92 = arith.constant 128 : index
    %148 = vector.load %arg9[%c0_91, %c128_92] : memref<16x401xbf16, #tpu.memory_space<vmem>>, vector<16x256xbf16>
    tpu.vector_store %arg9[%c0_91, %c128_92], %147 {strides = array<i32>} : memref<16x401xbf16, #tpu.memory_space<vmem>>, vector<16x256xbf16>,
    %c0_93 = arith.constant 0 : index
    %c111_94 = arith.constant 111 : index
    %149 = vector.load %arg9[%c0_93, %c111_94] : memref<16x401xbf16, #tpu.memory_space<vmem>>, vector<16x256xbf16>
    %c0_95 = arith.constant 0 : index
    %c127_96 = arith.constant 127 : index
    %150 = vector.load %arg9[%c0_95, %c127_96] : memref<16x401xbf16, #tpu.memory_space<vmem>>, vector<16x256xbf16>
    %c0_97 = arith.constant 0 : index
    %c143_98 = arith.constant 143 : index
    %151 = vector.load %arg9[%c0_97, %c143_98] : memref<16x401xbf16, #tpu.memory_space<vmem>>, vector<16x256xbf16>
    %152 = tpu.concatenate %149, %150, %151 in 0 : vector<16x256xbf16>, vector<16x256xbf16>, vector<16x256xbf16> -> vector<48x256xbf16>
    %153 = vector.extract_strided_slice %1 {offsets = [0, 0, 0], sizes = [1, 16, 48], strides = [1, 1, 1]} : vector<3x16x48xbf16> to vector<1x16x48xbf16>
    %154 = vector.shape_cast %153 : vector<1x16x48xbf16> to vector<16x48xbf16>
    %cst_99 = arith.constant dense<0.000000e+00> : vector<16x256xf32>
    %155 = tpu.matmul %154, %152, %cst_99 {dimension_numbers = #tpu.dot_dimension_numbers<[1], [0], [0], [1], [0, 0, 1, 1], [], []>} : vector<16x48xbf16>, vector<48x256xbf16>, vector<16x256xf32> -> vector<16x256xf32>
    %c0_100 = arith.constant 0 : index
    %c112_101 = arith.constant 112 : index
    %156 = vector.load %arg9[%c0_100, %c112_101] : memref<16x401xbf16, #tpu.memory_space<vmem>>, vector<16x256xbf16>
    %c0_102 = arith.constant 0 : index
    %c128_103 = arith.constant 128 : index
    %157 = vector.load %arg9[%c0_102, %c128_103] : memref<16x401xbf16, #tpu.memory_space<vmem>>, vector<16x256xbf16>
    %c0_104 = arith.constant 0 : index
    %c144_105 = arith.constant 144 : index
    %158 = vector.load %arg9[%c0_104, %c144_105] : memref<16x401xbf16, #tpu.memory_space<vmem>>, vector<16x256xbf16>
    %159 = tpu.concatenate %156, %157, %158 in 0 : vector<16x256xbf16>, vector<16x256xbf16>, vector<16x256xbf16> -> vector<48x256xbf16>
    %160 = vector.extract_strided_slice %1 {offsets = [1, 0, 0], sizes = [1, 16, 48], strides = [1, 1, 1]} : vector<3x16x48xbf16> to vector<1x16x48xbf16>
    %161 = vector.shape_cast %160 : vector<1x16x48xbf16> to vector<16x48xbf16>
    %cst_106 = arith.constant dense<0.000000e+00> : vector<16x256xf32>
    %162 = tpu.matmul %161, %159, %cst_106 {dimension_numbers = #tpu.dot_dimension_numbers<[1], [0], [0], [1], [0, 0, 1, 1], [], []>} : vector<16x48xbf16>, vector<48x256xbf16>, vector<16x256xf32> -> vector<16x256xf32>
    %c0_107 = arith.constant 0 : index
    %c113_108 = arith.constant 113 : index
    %163 = vector.load %arg9[%c0_107, %c113_108] : memref<16x401xbf16, #tpu.memory_space<vmem>>, vector<16x256xbf16>
    %c0_109 = arith.constant 0 : index
    %c129_110 = arith.constant 129 : index
    %164 = vector.load %arg9[%c0_109, %c129_110] : memref<16x401xbf16, #tpu.memory_space<vmem>>, vector<16x256xbf16>
    %c0_111 = arith.constant 0 : index
    %c145_112 = arith.constant 145 : index
    %165 = vector.load %arg9[%c0_111, %c145_112] : memref<16x401xbf16, #tpu.memory_space<vmem>>, vector<16x256xbf16>
    %166 = tpu.concatenate %163, %164, %165 in 0 : vector<16x256xbf16>, vector<16x256xbf16>, vector<16x256xbf16> -> vector<48x256xbf16>
    %167 = vector.extract_strided_slice %1 {offsets = [2, 0, 0], sizes = [1, 16, 48], strides = [1, 1, 1]} : vector<3x16x48xbf16> to vector<1x16x48xbf16>
    %168 = vector.shape_cast %167 : vector<1x16x48xbf16> to vector<16x48xbf16>
    %cst_113 = arith.constant dense<0.000000e+00> : vector<16x256xf32>
    %169 = tpu.matmul %168, %166, %cst_113 {dimension_numbers = #tpu.dot_dimension_numbers<[1], [0], [0], [1], [0, 0, 1, 1], [], []>} : vector<16x48xbf16>, vector<48x256xbf16>, vector<16x256xf32> -> vector<16x256xf32>
    %170 = vector.broadcast %26 : vector<1x256xf32> to vector<16x256xf32>
    %171 = arith.mulf %170, %155 : vector<16x256xf32>
    %172 = arith.addf %162, %171 : vector<16x256xf32>
    %173 = vector.broadcast %30 : vector<1x256xf32> to vector<16x256xf32>
    %174 = arith.mulf %173, %169 : vector<16x256xf32>
    %175 = arith.addf %172, %174 : vector<16x256xf32>
    %176 = vector.broadcast %4 : vector<16x1xf32> to vector<16x256xf32>
    %177 = arith.mulf %175, %176 : vector<16x256xf32>
    %178 = vector.broadcast %5 : vector<16x1xf32> to vector<16x256xf32>
    %179 = arith.addf %177, %178 : vector<16x256xf32>
    %180 = arith.addf %179, %111 : vector<16x256xf32>
    %cst_114 = arith.constant 0.000000e+00 : f32
    %181 = vector.broadcast %cst_114 : f32 to vector<16x256xf32>
    %182 = arith.maximumf %180, %181 : vector<16x256xf32>
    %c1_115 = arith.constant 1 : index
    %c0_116 = arith.constant 0 : index
    %c0_117 = arith.constant 0 : index
    %183 = vector.load %arg8[%c1_115, %c0_116, %c0_117] : memref<2x16x256xf32, #tpu.memory_space<vmem>>, vector<1x16x256xf32>
    %184 = vector.shape_cast %183 : vector<1x16x256xf32> to vector<16x256xf32>
    %185 = vector.shape_cast %182 : vector<16x256xf32> to vector<1x16x256xf32>
    tpu.vector_store %arg8[%c1_115, %c0_116, %c0_117], %185 {strides = array<i32>} : memref<2x16x256xf32, #tpu.memory_space<vmem>>, vector<1x16x256xf32>,
    return
  }
  func.func @transform_0(%arg0: i32) -> (i32, i32, i32) {
    %c0_i32 = arith.constant 0 : i32
    %c0_i32_0 = arith.constant 0 : i32
    %c0_i32_1 = arith.constant 0 : i32
    return %arg0, %c0_i32, %c0_i32_0 : i32, i32, i32
  }
  func.func @transform_1(%arg0: i32) -> (i32, i32, i32) {
    %c0_i32 = arith.constant 0 : i32
    %c0_i32_0 = arith.constant 0 : i32
    %c0_i32_1 = arith.constant 0 : i32
    %c0_i32_2 = arith.constant 0 : i32
    return %c0_i32, %c0_i32_0, %c0_i32_1 : i32, i32, i32
  }
  func.func @transform_2(%arg0: i32) -> (i32, i32) {
    %c0_i32 = arith.constant 0 : i32
    %c0_i32_0 = arith.constant 0 : i32
    %c0_i32_1 = arith.constant 0 : i32
    return %c0_i32, %c0_i32_0 : i32, i32
  }
  func.func @transform_3(%arg0: i32) -> (i32, i32) {
    %c0_i32 = arith.constant 0 : i32
    %c0_i32_0 = arith.constant 0 : i32
    %c0_i32_1 = arith.constant 0 : i32
    return %c0_i32, %c0_i32_0 : i32, i32
  }
  func.func @transform_4(%arg0: i32) -> (i32, i32, i32) {
    %c0_i32 = arith.constant 0 : i32
    %c0_i32_0 = arith.constant 0 : i32
    %c0_i32_1 = arith.constant 0 : i32
    %c0_i32_2 = arith.constant 0 : i32
    return %c0_i32, %c0_i32_0, %c0_i32_1 : i32, i32, i32
  }
  func.func @transform_5(%arg0: i32) -> (i32, i32) {
    %c0_i32 = arith.constant 0 : i32
    %c0_i32_0 = arith.constant 0 : i32
    %c0_i32_1 = arith.constant 0 : i32
    return %c0_i32, %c0_i32_0 : i32, i32
  }
  func.func @transform_6(%arg0: i32) -> (i32, i32) {
    %c0_i32 = arith.constant 0 : i32
    %c0_i32_0 = arith.constant 0 : i32
    %c0_i32_1 = arith.constant 0 : i32
    return %c0_i32, %c0_i32_0 : i32, i32
  }
  func.func @transform_7(%arg0: i32) -> (i32, i32, i32) {
    %c0_i32 = arith.constant 0 : i32
    %c0_i32_0 = arith.constant 0 : i32
    %c0_i32_1 = arith.constant 0 : i32
    return %arg0, %c0_i32, %c0_i32_0 : i32, i32, i32
  }
}

</mosaic_0001>

<bundles_post_ra>
// kernel: tpu_custom_call.1
= control target key start
LH: loop header
LB: loop body
LE: loop exit
PB: predicated region body
PF: predicated region fallthrough
CT: control target
= control target key end

     0   :  { %12 = vsyncpa [#allocation4], 0  ;;  %s2379_s0 = inlined_call_operand.vmem [shape: f32[2,16,256], index: 0, kind: input, shape index: {}]   ;;  %s2380_s1 = inlined_call_operand.hbm [shape: bf16[3,16,48], index: 1, kind: input, shape index: {}]   ;;  %s2381_s2 = inlined_call_operand.vmem [shape: f32[16,1], index: 2, kind: input, shape index: {}]   ;;  %s2382_s3 = inlined_call_operand.vmem [shape: f32[16,1], index: 3, kind: input, shape index: {}]   ;;  %s2383_s4 = inlined_call_operand.hbm [shape: bf16[3,16,48], index: 4, kind: input, shape index: {}]   ;;  %s2384_s5 = inlined_call_operand.vmem [shape: f32[16,1], index: 5, kind: input, shape index: {}]   ;;  %s2385_s6 = inlined_call_operand.vmem [shape: f32[16,1], index: 6, kind: input, shape index: {}]   ;;  %s2386_s7 = inlined_call_operand.hbm [shape: f32[2,16,256], index: 7, kind: output, shape index: {}]  }
   0x1   :  { %13 = vsyncpa [#allocation7], 0 }
   0x2   :  { %14 = vsyncpa [#allocation5], 0  ;;  %s1775_s24 = smov [#allocation3]  }
   0x3   :  { %s22_s25 = sshll.u32 %s1775_s24, 4  ;;  %s23_s25 = int_to_ptr.vmem [resolvable:$true] %s22_s25 }
   0x4   :  { %s1717_s26 = scalar_lea.vmem %s23_s25, 384  ;;  %p1722_p1 = scmp.lt.s32.totalorder %s23_s25, %s23_s25 }
   0x5   :  { %p1718_p0 = scmp.ne.s32.totalorder %s23_s25, %s1717_s26  ;;  %p1723_p2 = scmp.lt.s32.totalorder %s1717_s26, %s1717_s26 }
   0x7   :  { %p1724_p3 = por %p1723_p2, %p1722_p1 }
   0x9   :  { %p1725_p4 = pnand %p1724_p3, %p1718_p0 }
   0xb   :  { %1728 = shalt.err (!%p1725_p4)
}
   0xc   :  { %s1776_s27 = smov 64   ;;  %s1777_s28 = smov 4  }
   0xd   :  { %28 = dma.hbm_to_vmem [thread:$0]  %s2380_s1, 384, %s23_s25, [#allocation4], %s1776_s27, %s1776_s27, %s1777_s28  }
   0xe   :  { %s1778_s8 = smov [#allocation6]  }
   0xf   :  { %s38_s9 = sshll.u32 %s1778_s8, 4  ;;  %s39_s9 = int_to_ptr.vmem [resolvable:$true] %s38_s9 }
  0x10   :  { %s1737_s10 = scalar_lea.vmem %s39_s9, 384  ;;  %p1742_p6 = scmp.lt.s32.totalorder %s39_s9, %s39_s9 }
  0x11   :  { %p1738_p5 = scmp.ne.s32.totalorder %s39_s9, %s1737_s10  ;;  %p1743_p7 = scmp.lt.s32.totalorder %s1737_s10, %s1737_s10 }
  0x13   :  { %p1744_p8 = por %p1743_p7, %p1742_p6 }
  0x15   :  { %p1745_p9 = pnand %p1744_p8, %p1738_p5 }
  0x17   :  { %1748 = shalt.err (!%p1745_p9)
}
  0x18   :  { %44 = dma.hbm_to_vmem [thread:$0]  %s2383_s4, 384, %s39_s9, [#allocation7], %s1776_s27, %s1776_s27, %s1777_s28  }
  0x19   :  { %1769 = dma.done.wait [#allocation4], 384  }
  0x1a   :  { %1770 = vsyncadd [#allocation4], 4294966912 }
  0x1b   :  { %1771 = dma.done.wait [#allocation7], 384  }
  0x1c   :  { %1772 = vsyncadd [#allocation7], 4294966912  ;;  %vm118_vm0 = vcmask 134144   ;;  %vm115_vm1 = vcmask 1044344   ;;  %v1779_v0 = vmov 0   ;;  %v121_v1 = vld [vmem:[%s2379_s0] sm:$0xff] }
  0x1d   :  { %119 = vst.msk [vmem:[#allocation2 + $0xc] sm:$0xf] %vm118_vm0, %v1779_v0  ;;  %120 = vst.msk [vmem:[#allocation2 + $0x1c] sm:$0xf] %vm118_vm0, %v1779_v0  ;;  %263 = vmatprep.mubr.bf16.mxu0 %v1779_v0  ;;  %368 = vmatprep.mubr.bf16.mxu1 %v1779_v0  ;;  %v122_v2 = vld [vmem:[%s2379_s0 + $0x8] sm:$0xff]  ;;  %v123_v3 = vld [vmem:[%s2379_s0 + $0x10] sm:$0xff] }
  0x1e   :  { %116 = vst.msk [vmem:[#allocation2] sm:$0xf] %vm115_vm1, %v1779_v0  ;;  %117 = vst.msk [vmem:[#allocation2 + $0x10] sm:$0xf] %vm115_vm1, %v1779_v0  ;;  %1667 = vset.pattern.permute.xlu1 %v1779_v0  ;;  %1666 = vset.pattern.permute.xlu0 %v1779_v0  ;;  %v124_v4 = vld [vmem:[%s2379_s0 + $0x18] sm:$0xff]  ;;  %v1645_v5 = vpack.c.bf16 %v122_v2, %v121_v1  ;;  %v1701_v8 = vpack.c.bf16 %v123_v3, %v121_v1  ;;  %s1780_s19 = smov 96  }
  0x1f   :  { %v1646_v6 = vpack.c.bf16 %v124_v4, %v123_v3  ;;  %v1702_v9 = vpack.c.bf16 %v124_v4, %v122_v2  ;;  %s1781_s20 = smov 112   ;;  %s1782_s21 = smov 17   ;;  %vm188_vm2 = vcmask 785408   ;;  %vm166_vm3 = vcmask 916480   ;;  %v69_v31 = vld [vmem:[%s2381_s2 + $0x8] sm:$0xff]  ;;  %v68_v32 = vld [vmem:[%s2381_s2] sm:$0xff] }
  0x20   :  { %137 = vst [vmem:[#allocation2 + $0x4] sm:$0xff] %v1645_v5  ;;  %182 = vrot.lane.b32.xlu0 %v1701_v8, %s1780_s19  ;;  %s1783_s22 = smov 15   ;;  %s1784_s23 = smov 16   ;;  %v70_v33 = vld [vmem:[%s2382_s3] sm:$0xff]  ;;  %v71_v34 = vld [vmem:[%s2382_s3 + $0x8] sm:$0xff]  ;;  %vm214_vm4 = vcmask 138240  }
  0x21   :  { %138 = vst [vmem:[#allocation2 + $0x14] sm:$0xff] %v1646_v6  ;;  %vm320_vm5 = vcmask 121856   ;;  %vm406_vm6 = vcmask 130048   ;;  %v1921_v61 = vld [vmem:[#allocation3] sm:$0xff]   ;;  %vm227_vm7 = vcmask 392192   ;;  %s1786_s9 = smov [#allocation8]  }
  0x22   :  { %s1566_s10 = sshll.u32 %s1786_s9, 4  ;;  %s1567_s10 = int_to_ptr.vmem [resolvable:$true] %s1566_s10 }
  0x23   :  { %s1749_s1 = scalar_lea.vmem %s1567_s10, 1024  ;;  %p1754_p11 = scmp.lt.s32.totalorder %s1567_s10, %s1567_s10 }
  0x24   :  { %v1668_v7 = vld [vmem:[#allocation2 + $0xc] ss:$16 sps:$4 sm:$0xff]   ;;  %184 = vrot.lane.b32.xlu0 %v1702_v9, %s1780_s19  ;;  %p1750_p10 = scmp.ne.s32.totalorder %s1567_s10, %s1749_s1  ;;  %p1755_p12 = scmp.lt.s32.totalorder %s1749_s1, %s1749_s1 }
  0x25   :  { %186 = vrot.lane.b32.xlu1 %v1668_v7, %s1780_s19  ;;  %v1672_v12 = vld [vmem:[#allocation2] ss:$16 sps:$4 sm:$0xff]  }
  0x26   :  { %p1756_p13 = por %p1755_p12, %p1754_p11 }
  0x28   :  { %v1669_v10 = vld [vmem:[#allocation2 + $0x4] ss:$16 sps:$4 sm:$0xff]   ;;  %v1671_v11 = vld [vmem:[#allocation2 + $0x8] ss:$16 sps:$4 sm:$0xff]   ;;  %p1757_p0 = pnand %p1756_p13, %p1750_p10 }
  0x29   :  { %162 = vrot.lane.b32.xlu1 %v1669_v10, %s1781_s20  ;;  %164 = vrot.lane.b32.xlu0 %v1671_v11, %s1781_s20 }
  0x2d   :  { %160 = vrot.lane.b32.xlu1 %v1672_v12, %s1781_s20  ;;  %284 = vrot.lane.b32.xlu0 %v1701_v8, %s1781_s20 }
  0x31   :  { %286 = vrot.lane.b32.xlu1 %v1702_v9, %s1781_s20  ;;  %289 = vrot.lane.b32.xlu0 %v1701_v8, %s1781_s20 }
  0x35   :  { %291 = vrot.lane.b32.xlu1 %v1702_v9, %s1781_s20  ;;  %293 = vrot.lane.b32.xlu0 %v1668_v7, %s1781_s20 }
  0x39   :  { %198 = vrot.lane.b32.xlu1 %v1669_v10, %s1782_s21  ;;  %200 = vrot.lane.b32.xlu0 %v1671_v11, %s1782_s21 }
  0x3d   :  { %196 = vrot.lane.b32.xlu1 %v1672_v12, %s1782_s21  ;;  %304 = vrot.lane.b32.xlu0 %v1669_v10, %s1783_s22 }
  0x92   :  { %v183_v13 = vpop.permute.xlu0 %182 }
  0x93   :  { %314 = vrot.lane.b32.xlu0 %v183_v13, %s1783_s22  ;;  %208 = vrot.lane.b32.xlu1 %v183_v13, %s1782_s21 }
  0x96   :  { %v185_v15 = vpop.permute.xlu0 %184 }
  0x97   :  { %v187_v14 = vpop.permute.xlu1 %186  ;;  %v189_v24 = vsel %vm188_vm2, %v183_v13, %v185_v15 }
  0x98   :  { %v190_v22 = vsel %vm188_vm2, %v185_v15, %v187_v14 }
  0x9b   :  { %v163_v16 = vpop.permute.xlu1 %162  ;;  %v165_v17 = vpop.permute.xlu0 %164 }
  0x9c   :  { %206 = vrot.lane.b32.xlu1 %v165_v17, %s1782_s21  ;;  %v168_v23 = vsel %vm166_vm3, %v163_v16, %v165_v17 }
  0x9f   :  { %v161_v18 = vpop.permute.xlu1 %160  ;;  %v285_v19 = vpop.permute.xlu0 %284 }
  0xa0   :  { %400 = vrot.lane.b32.xlu1 %v183_v13, %s1784_s23  ;;  %v167_v25 = vsel %vm166_vm3, %v161_v18, %v163_v16  ;;  %v1936_v16 = vld [vmem:[#allocation3 + $0x8] sm:$0xff]  }
  0xa3   :  { %v287_v20 = vpop.permute.xlu1 %286  ;;  %v290_v21 = vpop.permute.xlu0 %289 }
  0xa4   :  { %308 = vrot.lane.b32.xlu0 %v290_v21, %s1783_s22  ;;  %398 = vrot.lane.b32.xlu1 %v287_v20, %s1784_s23  ;;  %v288_v30 = vsel %vm166_vm3, %v285_v19, %v287_v20  ;;  %v1676_v20 = vld [vmem:[#allocation2 + $0xc] ss:$16 sps:$4 sm:$0xff]  }
  0xa7   :  { %v294_v26 = vpop.permute.xlu0 %293  ;;  %v292_v27 = vpop.permute.xlu1 %291 }
  0xa8   :  { %212 = vrot.lane.b32.xlu0 %v190_v22, %s1782_s21  ;;  %394 = vrot.lane.b32.xlu1 %v285_v19, %s1784_s23  ;;  %v296_v28 = vsel %vm166_vm3, %v292_v27, %v294_v26  ;;  %v295_v29 = vsel %vm166_vm3, %v290_v21, %v292_v27  ;;  %v1940_v19 = vld [vmem:[#allocation3 + $0x10] sm:$0xff]   ;;  %v1677_v21 = vld [vmem:[#allocation2 + $0xc] ss:$16 sps:$4 sm:$0xff]  }
  0xab   :  { %v199_v35 = vpop.permute.xlu1 %198  ;;  %v201_v37 = vpop.permute.xlu0 %200 }
  0xac   :  { %204 = vrot.lane.b32.xlu0 %v168_v23, %s1782_s21  ;;  %210 = vrot.lane.b32.xlu1 %v189_v24, %s1782_s21  ;;  %v216_v55 = vsel %vm214_vm4, %v199_v35, %v201_v37 }
  0xaf   :  { %v197_v36 = vpop.permute.xlu1 %196  ;;  %v1911_v39 = vpop.permute.xlu0 %304 }
  0xb0   :  { %202 = vrot.lane.b32.xlu0 %v167_v25, %s1782_s21  ;;  %306 = vrot.lane.b32.xlu1 %v1671_v11, %s1783_s22  ;;  %v215_v60 = vsel %vm214_vm4, %v197_v36, %v199_v35 }
  0xb4   :  { %316 = vrot.lane.b32.xlu0 %v189_v24, %s1783_s22  ;;  %318 = vrot.lane.b32.xlu1 %v190_v22, %s1783_s22 }
  0xb8   :  { %402 = vrot.lane.b32.xlu0 %v189_v24, %s1784_s23  ;;  %404 = vrot.lane.b32.xlu1 %v190_v22, %s1784_s23  ;;  %v76_v22 = vlaneseq }
  0xba   :  { %v77_v23 = vand.u32 127, %v76_v22  ;;  %v1617_v22 = vld [vmem:[%s2379_s0 + $0x30] sm:$0xff] }
  0xbc   :  { %312 = vrot.lane.b32.xlu1 %v296_v28, %s1783_s22  ;;  %310 = vrot.lane.b32.xlu0 %v295_v29, %s1783_s22  ;;  %v78_v25 = vadd.s32 128, %v77_v23  ;;  %v83_v27 = vand.u32 15, %v77_v23  ;;  %v1618_v23 = vld [vmem:[%s2379_s0 + $0x38] sm:$0xff] }
  0xbe   :  { %v90_v28 = vand.u32 15, %v78_v25  ;;  %vm103_vm8 = vcmp.ge.s32.totalorder %v83_v27, 1  ;;  %vm109_vm10 = vcmp.le.s32.totalorder %v83_v27, 14  ;;  %v1650_v25 = vpack.c.bf16 %v1618_v23, %v1617_v22 }
  0xc0   :  { %392 = vrot.lane.b32.xlu1 %v1671_v11, %s1784_s23  ;;  %396 = vrot.lane.b32.xlu0 %v288_v30, %s1784_s23  ;;  %vm104_vm9 = vcmp.ge.s32.totalorder %v90_v28, 1  ;;  %vm110_vm11 = vcmp.le.s32.totalorder %v90_v28, 14 }
  0xc4   :  { %388 = vrot.lane.b32.xlu1 %v1672_v12, %s1784_s23  ;;  %390 = vrot.lane.b32.xlu0 %v1669_v10, %s1784_s23 }
  0xc8   :  { %302 = vrot.lane.b32.xlu0 %v1672_v12, %s1783_s22  ;;  %480 = vperm.xlu1 %1667, %v69_v31   ;;  %v1785_v31 = vmov 0.0  }
  0xc9   :  { %v1956_v35 = vsel %vm109_vm10, 1.0, %v1785_v31 }
  0xcc   :  { %475 = vperm.xlu0 %1666, %v68_v32   ;;  %489 = vperm.xlu1 %1667, %v70_v33   ;;  %v1952_v32 = vsel %vm103_vm8, 1.0, %v1785_v31 }
  0xd0   :  { %494 = vperm.xlu0 %1666, %v71_v34   ;;  %565 = vrot.lane.b32.xlu1 %v1676_v20, %s1780_s19  ;;  %v1954_v34 = vsel %vm104_vm9, 1.0, %v1785_v31 }
  0xd4   :  { %669 = vrot.lane.b32.xlu0 %v1676_v20, %s1781_s20  ;;  %v1615_v20 = vld [vmem:[%s2379_s0 + $0x20] sm:$0xff] }
  0xd8   :  { %952 = vrot.lane.b32.xlu0 %v1677_v21, %s1780_s19 }
  0xdc   :  { %1048 = vrot.lane.b32.xlu0 %v1677_v21, %s1781_s20  ;;  %v1616_v21 = vld [vmem:[%s2379_s0 + $0x28] sm:$0xff] }
 0x105   :  { %v209_v38 = vpop.permute.xlu1 %208  ;;  %v315_v41 = vpop.permute.xlu0 %314 }
 0x10e   :  { %v207_v40 = vpop.permute.xlu1 %206 }
 0x112   :  { %v401_v42 = vpop.permute.xlu1 %400 }
 0x116   :  { %v309_v43 = vpop.permute.xlu0 %308  ;;  %v399_v44 = vpop.permute.xlu1 %398 }
 0x11a   :  { %v213_v45 = vpop.permute.xlu0 %212  ;;  %v395_v46 = vpop.permute.xlu1 %394 }
 0x11e   :  { %v205_v47 = vpop.permute.xlu0 %204  ;;  %v211_v48 = vpop.permute.xlu1 %210 }
 0x11f   :  { %v220_v49 = vsel %vm214_vm4, %v211_v48, %v213_v45  ;;  %v219_v50 = vsel %vm214_vm4, %v209_v38, %v211_v48  ;;  %v218_v51 = vsel %vm214_vm4, %v205_v47, %v207_v40  ;;  %v1961_v40 = vsel %vm110_vm11, 1.0, %v1785_v31 }
 0x120   :  { %241 = vmatprep.subr.bf16.mxu0 %v220_v49  ;;  %v1705_v31 = vpack.c.bf16 %v1617_v22, %v1615_v20 }
 0x121   :  { %242 = vmatpush1.bf16.msra.mxu0 %v219_v50 }
 0x122   :  { %v203_v52 = vpop.permute.xlu0 %202  ;;  %243 = vmatprep.subr.bf16.mxu0 %v218_v51  ;;  %v307_v53 = vpop.permute.xlu1 %306 }
 0x123   :  { %v217_v54 = vsel %vm214_vm4, %v203_v52, %v205_v47  ;;  %v322_v7 = vsel %vm320_vm5, %v1911_v39, %v307_v53 }
 0x125   :  { %244 = vmatpush1.bf16.msra.mxu0 %v217_v54 }
 0x126   :  { %v317_v56 = vpop.permute.xlu0 %316  ;;  %245 = vmatprep.subr.bf16.mxu0 %v216_v55  ;;  %v319_v57 = vpop.permute.xlu1 %318 }
 0x127   :  { %v326_v58 = vsel %vm320_vm5, %v317_v56, %v319_v57  ;;  %v325_v59 = vsel %vm320_vm5, %v315_v41, %v317_v56 }
 0x128   :  { %346 = vmatprep.subr.bf16.mxu1 %v326_v58 }
 0x129   :  { %246 = vmatpush1.bf16.msra.mxu0 %v215_v60  ;;  %347 = vmatpush1.bf16.msra.mxu1 %v325_v59 }
 0x12a   :  { %v403_v62 = vpop.permute.xlu0 %402  ;;  %v405_v63 = vpop.permute.xlu1 %404 }
 0x12b   :  { %v412_v1 = vsel %vm406_vm6, %v403_v62, %v405_v63  ;;  %v411_v2 = vsel %vm406_vm6, %v401_v42, %v403_v62 }
 0x12c   :  { %432 = vmatprep.subr.bf16.mxu0 %v412_v1  ;;  %1592 = vmatmul.mubr.msk.bf16.vlgmr.msra.gmra.mxu0 %vm227_vm7, %v1921_v61 }
 0x12d   :  { %433 = vmatpush1.bf16.msra.mxu0 %v411_v2  ;;  %454 = vmatprep.mubr.bf16.mxu0 %v1779_v0 }
 0x12e   :  { %v311_v3 = vpop.permute.xlu0 %310  ;;  %v313_v4 = vpop.permute.xlu1 %312 }
 0x12f   :  { %v324_v5 = vsel %vm320_vm5, %v311_v3, %v313_v4  ;;  %v323_v6 = vsel %vm320_vm5, %v309_v43, %v311_v3 }
 0x130   :  { %348 = vmatprep.subr.bf16.mxu1 %v324_v5 }
 0x131   :  { %349 = vmatpush1.bf16.msra.mxu1 %v323_v6 }
 0x132   :  { %v397_v8 = vpop.permute.xlu0 %396  ;;  %350 = vmatprep.subr.bf16.mxu1 %v322_v7  ;;  %v393_v9 = vpop.permute.xlu1 %392 }
 0x133   :  { %v410_v10 = vsel %vm406_vm6, %v397_v8, %v399_v44  ;;  %v409_v11 = vsel %vm406_vm6, %v395_v46, %v397_v8 }
 0x134   :  { %434 = vmatprep.subr.bf16.mxu0 %v410_v10 }
 0x135   :  { %435 = vmatpush1.bf16.msra.mxu0 %v409_v11 }
 0x136   :  { %v391_v12 = vpop.permute.xlu0 %390  ;;  %v389_v13 = vpop.permute.xlu1 %388 }
 0x137   :  { %v407_v14 = vsel %vm406_vm6, %v389_v13, %v391_v12  ;;  %v408_v15 = vsel %vm406_vm6, %v391_v12, %v393_v9 }
 0x138   :  { %436 = vmatprep.subr.bf16.mxu0 %v408_v15 }
 0x139   :  { %437 = vmatpush1.bf16.msra.mxu0 %v407_v14 }
 0x13a   :  { %v303_v17 = vpop.permute.xlu0 %302 }
 0x13b   :  { %v321_v18 = vsel %vm320_vm5, %v303_v17, %v1911_v39 }
 0x13c   :  { %351 = vmatpush1.bf16.msra.mxu1 %v321_v18  ;;  %1598 = vmatmul.mubr.msk.bf16.vlgmr.msra.gmra.mxu0 %vm227_vm7, %v1936_v16 }
 0x13d   :  { %743 = vmatprep.mubr.bf16.mxu0 %v1779_v0 }
 0x13f   :  { %1596 = vmatmul.mubr.msk.bf16.vlgmr.msra.gmra.mxu1 %vm227_vm7, %v1940_v19 }
 0x140   :  { %639 = vmatprep.mubr.bf16.mxu1 %v1779_v0 }
 0x143   :  { %v1958_v36 = vpop.permute.xlu1 %480 }
 0x147   :  { %v1965_v46 = vpop.permute.xlu0 %475  ;;  %v1970_v54 = vpop.permute.xlu1 %489 }
 0x14b   :  { %v1979_v6 = vpop.permute.xlu0 %494 }
 0x1ec   :  { %v265_v24 = vpop.f32.mrf.mxu0 }
 0x1ed   :  { %v379_v37 = vmul.f32 %v1952_v32, %v265_v24  ;;  %v1649_v24 = vpack.c.bf16 %v1616_v21, %v1615_v20 }
 0x1ee   :  { %v267_v26 = vpop.f32.mrf.mxu0 }
 0x1ef   :  { %v380_v41 = vmul.f32 %v1954_v34, %v267_v26 }
 0x1f0   :  { %v269_v29 = vpop.f32.mrf.mxu0 }
 0x1f1   :  { %v381_v47 = vmul.f32 %v1952_v32, %v269_v29 }
 0x1f2   :  { %v271_v30 = vpop.f32.mrf.mxu0 }
 0x1f3   :  { %v382_v52 = vmul.f32 %v1954_v34, %v271_v30 }
 0x1fc   :  { %v456_v33 = vpop.f32.mrf.mxu0 }
 0x1fd   :  { %v457_v42 = vadd.f32 %v456_v33, %v379_v37  ;;  %v1706_v37 = vpack.c.bf16 %v1618_v23, %v1616_v21 }
 0x1fe   :  { %v458_v38 = vpop.f32.mrf.mxu0 }
 0x1ff   :  { %v370_v39 = vpop.f32.mrf.mxu1  ;;  %v459_v48 = vadd.f32 %v458_v38, %v380_v41  ;;  %v670_v41 = vpop.permute.xlu0 %669 }
 0x200   :  { %v465_v43 = vmul.f32 %v1956_v35, %v370_v39  ;;  %v460_v44 = vpop.f32.mrf.mxu0  ;;  %v2025_v39 = vld [vmem:[#allocation2] ss:$16 sps:$4 sm:$0xff]  }
 0x201   :  { %v372_v45 = vpop.f32.mrf.mxu1  ;;  %v461_v55 = vadd.f32 %v460_v44, %v381_v47 }
 0x202   :  { %v469_v49 = vadd.f32 %v465_v43, %v457_v42  ;;  %v466_v50 = vmul.f32 %v1961_v40, %v372_v45  ;;  %v462_v51 = vpop.f32.mrf.mxu0  ;;  %v566_v43 = vpop.permute.xlu1 %565 }
 0x203   :  { %v374_v53 = vpop.f32.mrf.mxu1  ;;  %v463_v59 = vadd.f32 %v462_v51, %v382_v52  ;;  %v2042_v42 = vpop.permute.xlu0 %952 }
 0x204   :  { %v470_v56 = vadd.f32 %v466_v50, %v459_v48  ;;  %v483_v57 = vmul.f32 %v1965_v46, %v469_v49  ;;  %v467_v58 = vmul.f32 %v1956_v35, %v374_v53 }
 0x205   :  { %v376_v60 = vpop.f32.mrf.mxu1 }
 0x206   :  { %v484_v62 = vmul.f32 %v1965_v46, %v470_v56  ;;  %v471_v63 = vadd.f32 %v467_v58, %v461_v55  ;;  %v497_v1 = vadd.f32 %v1970_v54, %v483_v57  ;;  %v468_v2 = vmul.f32 %v1961_v40, %v376_v60 }
 0x207   :  { %v2044_v44 = vpop.permute.xlu0 %1048 }
 0x208   :  { %v485_v3 = vmul.f32 %v1958_v36, %v471_v63  ;;  %v498_v4 = vadd.f32 %v1970_v54, %v484_v62  ;;  %v472_v5 = vadd.f32 %v468_v2, %v463_v59  ;;  %v501_v7 = vmax.f32 %v497_v1, 0.0 }
 0x20a   :  { %v502_v8 = vmax.f32 %v498_v4, 0.0  ;;  %v486_v9 = vmul.f32 %v1958_v36, %v472_v5  ;;  %v499_v10 = vadd.f32 %v1979_v6, %v485_v3 }
 0x20c   :  { %v1647_v11 = vpack.c.bf16 %v502_v8, %v501_v7  ;;  %v500_v12 = vadd.f32 %v1979_v6, %v486_v9  ;;  %v503_v13 = vmax.f32 %v499_v10, 0.0 }
 0x20e   :  { %517 = vst [vmem:[#allocation2 + $0x4] sm:$0xff] %v1647_v11  ;;  %v504_v14 = vmax.f32 %v500_v12, 0.0  ;;  %v1704_v18 = vpack.c.bf16 %v503_v13, %v501_v7 }
 0x210   :  { %v1648_v15 = vpack.c.bf16 %v504_v14, %v503_v13  ;;  %v1703_v17 = vpack.c.bf16 %v504_v14, %v502_v8  ;;  %561 = vrot.lane.b32.xlu1 %v1704_v18, %s1780_s19 }
 0x212   :  { %518 = vst [vmem:[#allocation2 + $0x14] sm:$0xff] %v1648_v15  ;;  %563 = vrot.lane.b32.xlu0 %v1703_v17, %s1780_s19 }
 0x219   :  { %v1678_v26 = vld [vmem:[#allocation2 + $0x8] ss:$16 sps:$4 sm:$0xff]   ;;  %v1679_v27 = vld [vmem:[#allocation2 + $0x4] ss:$16 sps:$4 sm:$0xff]  }
 0x21a   :  { %544 = vrot.lane.b32.xlu1 %v1678_v26, %s1781_s20  ;;  %904 = vst [vmem:[#allocation2 + $0x4] sm:$0xff] %v1649_v24  ;;  %905 = vst [vmem:[#allocation2 + $0x14] sm:$0xff] %v1650_v25  ;;  %542 = vrot.lane.b32.xlu0 %v1679_v27, %s1781_s20 }
 0x21e   :  { %667 = vrot.lane.b32.xlu1 %v1703_v17, %s1781_s20  ;;  %665 = vrot.lane.b32.xlu0 %v1704_v18, %s1781_s20 }
 0x221   :  { %v521_v28 = vld [vmem:[#allocation2 + $0x10] sm:$0xff]  ;;  %v519_v29 = vld [vmem:[#allocation2] sm:$0xff]  ;;  %v2014_v33 = vld [vmem:[#allocation2 + $0x8] ss:$16 sps:$4 sm:$0xff]  }
 0x222   :  { %v1601_v30 = vcombine.low %v519_v29, %v521_v28  ;;  %662 = vrot.lane.b32.xlu0 %v1703_v17, %s1781_s20  ;;  %v2020_v38 = vld [vmem:[#allocation2 + $0x4] ss:$16 sps:$4 sm:$0xff]  }
 0x224   :  { %540 = vrot.lane.b32.xlu1 %v1601_v30, %s1781_s20 }
 0x226   :  { %578 = vrot.lane.b32.xlu0 %v1678_v26, %s1782_s21 }
 0x228   :  { %660 = vrot.lane.b32.xlu1 %v1704_v18, %s1781_s20 }
 0x22a   :  { %682 = vrot.lane.b32.xlu0 %v1678_v26, %s1783_s22 }
 0x22c   :  { %576 = vrot.lane.b32.xlu1 %v1679_v27, %s1782_s21 }
 0x22e   :  { %678 = vrot.lane.b32.xlu0 %v1601_v30, %s1783_s22 }
 0x230   :  { %680 = vrot.lane.b32.xlu1 %v1679_v27, %s1783_s22 }
 0x232   :  { %767 = vrot.lane.b32.xlu0 %v1678_v26, %s1784_s23 }
 0x234   :  { %574 = vrot.lane.b32.xlu1 %v1601_v30, %s1782_s21 }
 0x236   :  { %948 = vrot.lane.b32.xlu0 %v1705_v31, %s1780_s19 }
 0x238   :  { %765 = vrot.lane.b32.xlu1 %v1679_v27, %s1784_s23 }
 0x23a   :  { %931 = vrot.lane.b32.xlu0 %v2014_v33, %s1781_s20 }
 0x23c   :  { %763 = vrot.lane.b32.xlu1 %v1601_v30, %s1784_s23 }
 0x23e   :  { %1039 = vrot.lane.b32.xlu0 %v1705_v31, %s1781_s20 }
 0x240   :  { %950 = vrot.lane.b32.xlu1 %v1706_v37, %s1780_s19 }
 0x242   :  { %1044 = vrot.lane.b32.xlu0 %v1705_v31, %s1781_s20 }
 0x244   :  { %929 = vrot.lane.b32.xlu1 %v2020_v38, %s1781_s20 }
 0x246   :  { %960 = vrot.lane.b32.xlu0 %v2014_v33, %s1782_s21 }
 0x248   :  { %927 = vrot.lane.b32.xlu1 %v2025_v39, %s1781_s20 }
 0x24a   :  { %956 = vrot.lane.b32.xlu0 %v2025_v39, %s1782_s21 }
 0x24c   :  { %1041 = vrot.lane.b32.xlu1 %v1706_v37, %s1781_s20 }
 0x24e   :  { %1056 = vrot.lane.b32.xlu0 %v2014_v33, %s1783_s22 }
 0x250   :  { %1046 = vrot.lane.b32.xlu1 %v1706_v37, %s1781_s20 }
 0x254   :  { %958 = vrot.lane.b32.xlu1 %v2020_v38, %s1782_s21 }
 0x258   :  { %1054 = vrot.lane.b32.xlu1 %v2020_v38, %s1783_s22 }
 0x282   :  { %v562_v45 = vpop.permute.xlu1 %561 }
 0x283   :  { %690 = vrot.lane.b32.xlu0 %v562_v45, %s1783_s22  ;;  %586 = vrot.lane.b32.xlu1 %v562_v45, %s1782_s21 }
 0x284   :  { %v564_v47 = vpop.permute.xlu0 %563 }
 0x285   :  { %v568_v57 = vsel %vm188_vm2, %v564_v47, %v566_v43  ;;  %v567_v59 = vsel %vm188_vm2, %v562_v45, %v564_v47 }
 0x287   :  { %775 = vrot.lane.b32.xlu1 %v562_v45, %s1784_s23 }
 0x28c   :  { %v545_v48 = vpop.permute.xlu1 %544  ;;  %v543_v49 = vpop.permute.xlu0 %542 }
 0x28d   :  { %584 = vrot.lane.b32.xlu0 %v545_v48, %s1782_s21  ;;  %v547_v3 = vsel %vm166_vm3, %v543_v49, %v545_v48 }
 0x290   :  { %v668_v50 = vpop.permute.xlu1 %667  ;;  %v666_v51 = vpop.permute.xlu0 %665 }
 0x291   :  { %684 = vrot.lane.b32.xlu0 %v666_v51, %s1783_s22  ;;  %v672_v1 = vsel %vm166_vm3, %v668_v50, %v670_v41  ;;  %v671_v7 = vsel %vm166_vm3, %v666_v51, %v668_v50 }
 0x294   :  { %v663_v53 = vpop.permute.xlu0 %662 }
 0x295   :  { %773 = vrot.lane.b32.xlu0 %v663_v53, %s1784_s23 }
 0x296   :  { %v541_v52 = vpop.permute.xlu1 %540 }
 0x297   :  { %v546_v10 = vsel %vm166_vm3, %v541_v52, %v543_v49 }
 0x298   :  { %v2052_v56 = vpop.permute.xlu0 %578 }
 0x299   :  { %590 = vrot.lane.b32.xlu0 %v568_v57, %s1782_s21 }
 0x29a   :  { %v661_v55 = vpop.permute.xlu1 %660 }
 0x29b   :  { %769 = vrot.lane.b32.xlu1 %v661_v55, %s1784_s23  ;;  %v664_v14 = vsel %vm166_vm3, %v661_v55, %v663_v53 }
 0x29c   :  { %v2060_v60 = vpop.permute.xlu0 %682 }
 0x29d   :  { %694 = vrot.lane.b32.xlu0 %v568_v57, %s1783_s22 }
 0x29e   :  { %v2057_v58 = vpop.permute.xlu1 %576 }
 0x29f   :  { %588 = vrot.lane.b32.xlu1 %v567_v59, %s1782_s21 }
 0x2a0   :  { %v2066_v63 = vpop.permute.xlu0 %678 }
 0x2a1   :  { %688 = vrot.lane.b32.xlu0 %v672_v1, %s1783_s22 }
 0x2a2   :  { %v2064_v62 = vpop.permute.xlu1 %680 }
 0x2a3   :  { %692 = vrot.lane.b32.xlu1 %v567_v59, %s1783_s22 }
 0x2a4   :  { %v2074_v4 = vpop.permute.xlu0 %767 }
 0x2a5   :  { %779 = vrot.lane.b32.xlu0 %v568_v57, %s1784_s23 }
 0x2a6   :  { %v2071_v2 = vpop.permute.xlu1 %574 }
 0x2a7   :  { %582 = vrot.lane.b32.xlu1 %v547_v3, %s1782_s21 }
 0x2a8   :  { %v949_v8 = vpop.permute.xlu0 %948 }
 0x2a9   :  { %968 = vrot.lane.b32.xlu0 %v949_v8, %s1782_s21 }
 0x2aa   :  { %v2078_v5 = vpop.permute.xlu1 %765 }
 0x2ab   :  { %686 = vrot.lane.b32.xlu1 %v671_v7, %s1783_s22 }
 0x2ac   :  { %v932_v11 = vpop.permute.xlu0 %931 }
 0x2ad   :  { %966 = vrot.lane.b32.xlu0 %v932_v11, %s1782_s21 }
 0x2ae   :  { %v2083_v9 = vpop.permute.xlu1 %763 }
 0x2af   :  { %580 = vrot.lane.b32.xlu1 %v546_v10, %s1782_s21 }
 0x2b0   :  { %v1040_v15 = vpop.permute.xlu0 %1039 }
 0x2b1   :  { %1141 = vrot.lane.b32.xlu0 %v949_v8, %s1784_s23 }
 0x2b2   :  { %v951_v12 = vpop.permute.xlu1 %950 }
 0x2b3   :  { %777 = vrot.lane.b32.xlu1 %v567_v59, %s1784_s23  ;;  %v954_v22 = vsel %vm188_vm2, %v949_v8, %v951_v12  ;;  %v955_v24 = vsel %vm188_vm2, %v951_v12, %v2042_v42 }
 0x2b4   :  { %v1045_v18 = vpop.permute.xlu0 %1044 }
 0x2b6   :  { %v930_v13 = vpop.permute.xlu1 %929 }
 0x2b7   :  { %771 = vrot.lane.b32.xlu1 %v664_v14, %s1784_s23  ;;  %v934_v25 = vsel %vm166_vm3, %v930_v13, %v932_v11 }
 0x2b8   :  { %v961_v21 = vpop.permute.xlu0 %960 }
 0x2ba   :  { %v928_v17 = vpop.permute.xlu1 %927 }
 0x2bb   :  { %1064 = vrot.lane.b32.xlu1 %v949_v8, %s1783_s22  ;;  %v933_v30 = vsel %vm166_vm3, %v928_v17, %v930_v13  ;;  %v697_v13 = vsel %vm320_vm5, %v2064_v62, %v2060_v60  ;;  %v592_v60 = vsel %vm214_vm4, %v2071_v2, %v2057_v58 }
 0x2bc   :  { %v957_v26 = vpop.permute.xlu0 %956 }
 0x2be   :  { %v1042_v20 = vpop.permute.xlu1 %1041 }
 0x2bf   :  { %1058 = vrot.lane.b32.xlu1 %v1045_v18, %s1783_s22  ;;  %1139 = vrot.lane.b32.xlu0 %v1042_v20, %s1784_s23  ;;  %v1043_v37 = vsel %vm166_vm3, %v1040_v15, %v1042_v20  ;;  %v696_v20 = vsel %vm320_vm5, %v2066_v63, %v2064_v62 }
 0x2c0   :  { %v2130_v42 = vpop.permute.xlu0 %1056 }
 0x2c2   :  { %v1047_v23 = vpop.permute.xlu1 %1046 }
 0x2c3   :  { %970 = vrot.lane.b32.xlu1 %v954_v22, %s1782_s21  ;;  %1135 = vrot.lane.b32.xlu0 %v1040_v15, %s1784_s23  ;;  %v1050_v31 = vsel %vm166_vm3, %v1045_v18, %v1047_v23  ;;  %v1051_v41 = vsel %vm166_vm3, %v1047_v23, %v2044_v44  ;;  %v593_v18 = vsel %vm214_vm4, %v2057_v58, %v2052_v56 }
 0x2c6   :  { %v959_v27 = vpop.permute.xlu1 %958 }
 0x2c7   :  { %964 = vrot.lane.b32.xlu1 %v934_v25, %s1782_s21  ;;  %972 = vrot.lane.b32.xlu0 %v955_v24, %s1782_s21  ;;  %v2104_v28 = vsel %vm214_vm4, %v957_v26, %v959_v27  ;;  %v2107_v29 = vsel %vm214_vm4, %v959_v27, %v961_v21  ;;  %v2151_v21 = vld [vmem:[#allocation6 + $0x10] sm:$0xff]   ;;  %v782_v27 = vsel %vm406_vm6, %v2078_v5, %v2074_v4 }
 0x2ca   :  { %v2132_v43 = vpop.permute.xlu1 %1054 }
 0x2cb   :  { %1066 = vrot.lane.b32.xlu1 %v954_v22, %s1783_s22  ;;  %962 = vrot.lane.b32.xlu0 %v933_v30, %s1782_s21 }
 0x2cf   :  { %1143 = vrot.lane.b32.xlu1 %v954_v22, %s1784_s23  ;;  %1068 = vrot.lane.b32.xlu0 %v955_v24, %s1783_s22 }
 0x2d3   :  { %1145 = vrot.lane.b32.xlu0 %v955_v24, %s1784_s23  ;;  %1060 = vrot.lane.b32.xlu1 %v1050_v31, %s1783_s22  ;;  %v2157_v24 = vld [vmem:[#allocation6] sm:$0xff]  }
 0x2d7   :  { %1062 = vrot.lane.b32.xlu0 %v1051_v41, %s1783_s22  ;;  %1137 = vrot.lane.b32.xlu1 %v1043_v37, %s1784_s23  ;;  %v781_v37 = vsel %vm406_vm6, %v2083_v9, %v2078_v5  ;;  %v2174_v41 = vld [vmem:[#allocation6 + $0x8] sm:$0xff]  }
 0x2db   :  { %1133 = vrot.lane.b32.xlu0 %v2014_v33, %s1784_s23  ;;  %1131 = vrot.lane.b32.xlu1 %v2020_v38, %s1784_s23 }
 0x2df   :  { %1129 = vrot.lane.b32.xlu0 %v2025_v39, %s1784_s23  ;;  %1052 = vrot.lane.b32.xlu1 %v2025_v39, %s1783_s22 }
 0x2f5   :  { %v691_v44 = vpop.permute.xlu0 %690  ;;  %v587_v47 = vpop.permute.xlu1 %586 }
 0x2f9   :  { %v776_v49 = vpop.permute.xlu1 %775 }
 0x2ff   :  { %v585_v45 = vpop.permute.xlu0 %584 }
 0x303   :  { %v685_v48 = vpop.permute.xlu0 %684 }
 0x307   :  { %v774_v50 = vpop.permute.xlu0 %773 }
 0x30b   :  { %v591_v51 = vpop.permute.xlu0 %590 }
 0x30d   :  { %v770_v33 = vpop.permute.xlu1 %769 }
 0x30f   :  { %v695_v38 = vpop.permute.xlu0 %694 }
 0x311   :  { %v589_v52 = vpop.permute.xlu1 %588 }
 0x312   :  { %v596_v53 = vsel %vm214_vm4, %v587_v47, %v589_v52  ;;  %v597_v55 = vsel %vm214_vm4, %v589_v52, %v591_v51 }
 0x313   :  { %617 = vmatprep.subr.bf16.mxu1 %v597_v55  ;;  %v689_v57 = vpop.permute.xlu0 %688 }
 0x314   :  { %618 = vmatpush1.bf16.msra.mxu1 %v596_v53 }
 0x315   :  { %v693_v39 = vpop.permute.xlu1 %692 }
 0x316   :  { %v700_v59 = vsel %vm320_vm5, %v691_v44, %v693_v39  ;;  %v701_v1 = vsel %vm320_vm5, %v693_v39, %v695_v38 }
 0x317   :  { %721 = vmatprep.subr.bf16.mxu0 %v701_v1  ;;  %v780_v8 = vpop.permute.xlu0 %779 }
 0x318   :  { %722 = vmatpush1.bf16.msra.mxu0 %v700_v59 }
 0x319   :  { %v583_v3 = vpop.permute.xlu1 %582 }
 0x31a   :  { %v595_v7 = vsel %vm214_vm4, %v583_v3, %v585_v45 }
 0x31b   :  { %619 = vmatprep.subr.bf16.mxu1 %v595_v7  ;;  %v969_v14 = vpop.permute.xlu0 %968 }
 0x31d   :  { %v687_v10 = vpop.permute.xlu1 %686 }
 0x31e   :  { %v698_v11 = vsel %vm320_vm5, %v685_v48, %v687_v10  ;;  %v699_v12 = vsel %vm320_vm5, %v687_v10, %v689_v57 }
 0x31f   :  { %723 = vmatprep.subr.bf16.mxu0 %v699_v12  ;;  %v967_v25 = vpop.permute.xlu0 %966 }
 0x320   :  { %724 = vmatpush1.bf16.msra.mxu0 %v698_v11 }
 0x321   :  { %725 = vmatprep.subr.bf16.mxu0 %v697_v13  ;;  %v581_v15 = vpop.permute.xlu1 %580 }
 0x322   :  { %v594_v17 = vsel %vm214_vm4, %v581_v15, %v583_v3 }
 0x323   :  { %620 = vmatpush1.bf16.msra.mxu1 %v594_v17  ;;  %v1142_v63 = vpop.permute.xlu0 %1141 }
 0x324   :  { %621 = vmatprep.subr.bf16.mxu1 %v593_v18  ;;  %726 = vmatpush1.bf16.msra.mxu0 %v696_v20 }
 0x325   :  { %v778_v22 = vpop.permute.xlu1 %777 }
 0x326   :  { %v786_v23 = vsel %vm406_vm6, %v778_v22, %v780_v8  ;;  %v785_v62 = vsel %vm406_vm6, %v776_v49, %v778_v22 }
 0x327   :  { %622 = vmatpush1.bf16.msra.mxu1 %v592_v60  ;;  %1612 = vmatmul.mubr.msk.bf16.vlgmr.msra.gmra.mxu0 %vm227_vm7, %v2151_v21 }
 0x328   :  { %806 = vmatprep.subr.bf16.mxu1 %v786_v23  ;;  %1018 = vmatprep.mubr.bf16.mxu0 %v1779_v0 }
 0x329   :  { %v772_v56 = vpop.permute.xlu1 %771 }
 0x32a   :  { %1608 = vmatmul.mubr.msk.bf16.vlgmr.msra.gmra.mxu1 %vm227_vm7, %v2157_v24  ;;  %v784_v58 = vsel %vm406_vm6, %v772_v56, %v774_v50  ;;  %v783_v26 = vsel %vm406_vm6, %v770_v33, %v772_v56 }
 0x32b   :  { %807 = vmatpush1.bf16.msra.mxu1 %v785_v62  ;;  %828 = vmatprep.mubr.bf16.mxu1 %v1779_v0 }
 0x32c   :  { %808 = vmatprep.subr.bf16.mxu1 %v784_v58 }
 0x32d   :  { %v1065_v2 = vpop.permute.xlu1 %1064 }
 0x32f   :  { %809 = vmatpush1.bf16.msra.mxu1 %v783_v26 }
 0x330   :  { %810 = vmatprep.subr.bf16.mxu1 %v782_v27 }
 0x331   :  { %v1140_v30 = vpop.permute.xlu0 %1139  ;;  %v1059_v31 = vpop.permute.xlu1 %1058 }
 0x333   :  { %811 = vmatpush1.bf16.msra.mxu1 %v781_v37 }
 0x335   :  { %v1136_v44 = vpop.permute.xlu0 %1135  ;;  %v971_v45 = vpop.permute.xlu1 %970 }
 0x336   :  { %1614 = vmatmul.mubr.msk.bf16.vlgmr.msra.gmra.mxu1 %vm227_vm7, %v2174_v41  ;;  %v978_v49 = vsel %vm214_vm4, %v969_v14, %v971_v45 }
 0x337   :  { %1114 = vmatprep.mubr.bf16.mxu1 %v1779_v0 }
 0x339   :  { %v973_v47 = vpop.permute.xlu0 %972  ;;  %v965_v48 = vpop.permute.xlu1 %964 }
 0x33a   :  { %v979_v4 = vsel %vm214_vm4, %v971_v45, %v973_v47  ;;  %v977_v5 = vsel %vm214_vm4, %v965_v48, %v967_v25 }
 0x33b   :  { %996 = vmatprep.subr.bf16.mxu0 %v979_v4 }
 0x33c   :  { %997 = vmatpush1.bf16.msra.mxu0 %v978_v49 }
 0x33d   :  { %v963_v9 = vpop.permute.xlu0 %962  ;;  %998 = vmatprep.subr.bf16.mxu0 %v977_v5  ;;  %v1067_v50 = vpop.permute.xlu1 %1066 }
 0x33e   :  { %v976_v33 = vsel %vm214_vm4, %v963_v9, %v965_v48  ;;  %v1074_v53 = vsel %vm320_vm5, %v1065_v2, %v1067_v50 }
 0x340   :  { %999 = vmatpush1.bf16.msra.mxu0 %v976_v33 }
 0x341   :  { %v1069_v51 = vpop.permute.xlu0 %1068  ;;  %1000 = vmatprep.subr.bf16.mxu0 %v2107_v29  ;;  %v1144_v52 = vpop.permute.xlu1 %1143 }
 0x342   :  { %v1075_v38 = vsel %vm320_vm5, %v1067_v50, %v1069_v51  ;;  %v1151_v59 = vsel %vm406_vm6, %v1142_v63, %v1144_v52 }
 0x343   :  { %1092 = vmatprep.subr.bf16.mxu1 %v1075_v38 }
 0x344   :  { %1001 = vmatpush1.bf16.msra.mxu0 %v2104_v28  ;;  %1093 = vmatpush1.bf16.msra.mxu1 %v1074_v53 }
 0x345   :  { %v1146_v55 = vpop.permute.xlu0 %1145  ;;  %v1061_v39 = vpop.permute.xlu1 %1060 }
 0x346   :  { %v1152_v57 = vsel %vm406_vm6, %v1144_v52, %v1146_v55  ;;  %v1072_v8 = vsel %vm320_vm5, %v1059_v31, %v1061_v39 }
 0x347   :  { %1627 = vmatmul.mubr.msk.bf16.vlgmr.msra.gmra.mxu0 %vm227_vm7, %v1921_v61  ;;  %1169 = vmatprep.subr.bf16.mxu0 %v1152_v57  ;;  %v1071_v61 = vsel %vm320_vm5, %v2132_v43, %v2130_v42  ;;  %v2209_v42 = vld [vmem:[#allocation2 + $0xc] ss:$16 sps:$4 sm:$0xff]  }
 0x348   :  { %1170 = vmatpush1.bf16.msra.mxu0 %v1151_v59  ;;  %1191 = vmatprep.mubr.bf16.mxu0 %v1779_v0 }
 0x349   :  { %v1063_v29 = vpop.permute.xlu0 %1062  ;;  %v1138_v1 = vpop.permute.xlu1 %1137  ;;  %1282 = vrot.lane.b32.xlu1 %v2209_v42, %s1780_s19 }
 0x34a   :  { %v1149_v3 = vsel %vm406_vm6, %v1136_v44, %v1138_v1  ;;  %v1073_v28 = vsel %vm320_vm5, %v1061_v39, %v1063_v29  ;;  %v1150_v7 = vsel %vm406_vm6, %v1138_v1, %v1140_v30 }
 0x34b   :  { %1094 = vmatprep.subr.bf16.mxu1 %v1073_v28  ;;  %1171 = vmatprep.subr.bf16.mxu0 %v1150_v7 }
 0x34c   :  { %1095 = vmatpush1.bf16.msra.mxu1 %v1072_v8  ;;  %1172 = vmatpush1.bf16.msra.mxu0 %v1149_v3 }
 0x34d   :  { %v1134_v10 = vpop.permute.xlu0 %1133  ;;  %1096 = vmatprep.subr.bf16.mxu1 %v1071_v61  ;;  %v1132_v11 = vpop.permute.xlu1 %1131 }
 0x34e   :  { %v1148_v12 = vsel %vm406_vm6, %v1132_v11, %v1134_v10 }
 0x34f   :  { %1173 = vmatprep.subr.bf16.mxu0 %v1148_v12 }
 0x351   :  { %v1130_v13 = vpop.permute.xlu0 %1129  ;;  %v1053_v14 = vpop.permute.xlu1 %1052 }
 0x352   :  { %v1147_v15 = vsel %vm406_vm6, %v1130_v13, %v1132_v11  ;;  %v1070_v17 = vsel %vm320_vm5, %v1053_v14, %v2132_v43 }
 0x353   :  { %1097 = vmatpush1.bf16.msra.mxu1 %v1070_v17  ;;  %1174 = vmatpush1.bf16.msra.mxu0 %v1147_v15 }
 0x356   :  { %1630 = vmatmul.mubr.msk.bf16.vlgmr.msra.gmra.mxu1 %vm227_vm7, %v1940_v19  ;;  %1631 = vmatmul.mubr.msk.bf16.vlgmr.msra.gmra.mxu0 %vm227_vm7, %v1936_v16 }
 0x357   :  { %1348 = vmatprep.mubr.bf16.mxu1 %v1779_v0  ;;  %1444 = vmatprep.mubr.bf16.mxu0 %v1779_v0 }
 0x3e7   :  { %v745_v43 = vpop.f32.mrf.mxu0 }
 0x3e8   :  { %v839_v56 = vmul.f32 %v1956_v35, %v745_v43 }
 0x3e9   :  { %v747_v60 = vpop.f32.mrf.mxu0 }
 0x3ea   :  { %v641_v18 = vpop.f32.mrf.mxu1  ;;  %v840_v2 = vmul.f32 %v1961_v40, %v747_v60 }
 0x3eb   :  { %v754_v19 = vmul.f32 %v1952_v32, %v641_v18  ;;  %v749_v25 = vpop.f32.mrf.mxu0 }
 0x3ec   :  { %v643_v20 = vpop.f32.mrf.mxu1  ;;  %v841_v44 = vmul.f32 %v1956_v35, %v749_v25 }
 0x3ed   :  { %v755_v16 = vmul.f32 %v1954_v34, %v643_v20  ;;  %v751_v27 = vpop.f32.mrf.mxu0 }
 0x3ee   :  { %v645_v22 = vpop.f32.mrf.mxu1  ;;  %v842_v4 = vmul.f32 %v1961_v40, %v751_v27 }
 0x3ef   :  { %v756_v58 = vmul.f32 %v1952_v32, %v645_v22 }
 0x3f0   :  { %v647_v23 = vpop.f32.mrf.mxu1 }
 0x3f1   :  { %v757_v30 = vmul.f32 %v1954_v34, %v647_v23 }
 0x3f6   :  { %v830_v62 = vpop.f32.mrf.mxu1 }
 0x3f7   :  { %v831_v63 = vadd.f32 %v830_v62, %v754_v19 }
 0x3f8   :  { %v832_v26 = vpop.f32.mrf.mxu1 }
 0x3f9   :  { %v2219_v31 = vadd.f32 %v839_v56, %v831_v63  ;;  %v833_v37 = vadd.f32 %v832_v26, %v755_v16 }
 0x3fa   :  { %v834_v45 = vpop.f32.mrf.mxu1 }
 0x3fb   :  { %v2222_v47 = vadd.f32 %v840_v2, %v833_v37  ;;  %v835_v48 = vadd.f32 %v834_v45, %v756_v58 }
 0x3fc   :  { %v836_v49 = vpop.f32.mrf.mxu1 }
 0x3fd   :  { %v2225_v5 = vadd.f32 %v841_v44, %v835_v48  ;;  %v837_v9 = vadd.f32 %v836_v49, %v757_v30 }
 0x3ff   :  { %v2227_v50 = vadd.f32 %v842_v4, %v837_v9 }
 0x407   :  { %v1020_v33 = vpop.f32.mrf.mxu0 }
 0x408   :  { %v1125_v53 = vmul.f32 %v1952_v32, %v1020_v33 }
 0x409   :  { %v1022_v51 = vpop.f32.mrf.mxu0 }
 0x40a   :  { %v1126_v57 = vmul.f32 %v1954_v34, %v1022_v51 }
 0x40b   :  { %v1024_v52 = vpop.f32.mrf.mxu0 }
 0x40c   :  { %v1127_v28 = vmul.f32 %v1952_v32, %v1024_v52 }
 0x40d   :  { %v1026_v38 = vpop.f32.mrf.mxu0 }
 0x40e   :  { %v1128_v17 = vmul.f32 %v1954_v34, %v1026_v38 }
 0x416   :  { %v1116_v55 = vpop.f32.mrf.mxu1  ;;  %v1193_v39 = vpop.f32.mrf.mxu0 }
 0x417   :  { %v1202_v59 = vmul.f32 %v1956_v35, %v1116_v55  ;;  %v1194_v29 = vadd.f32 %v1193_v39, %v1125_v53 }
 0x418   :  { %v1118_v1 = vpop.f32.mrf.mxu1  ;;  %v1195_v3 = vpop.f32.mrf.mxu0 }
 0x419   :  { %v1206_v7 = vadd.f32 %v1202_v59, %v1194_v29  ;;  %v1203_v8 = vmul.f32 %v1961_v40, %v1118_v1  ;;  %v1196_v61 = vadd.f32 %v1195_v3, %v1126_v57 }
 0x41a   :  { %v1120_v10 = vpop.f32.mrf.mxu1  ;;  %v1197_v11 = vpop.f32.mrf.mxu0 }
 0x41b   :  { %v1210_v12 = vmul.f32 %v1206_v7, %v1965_v46  ;;  %v1207_v13 = vadd.f32 %v1203_v8, %v1196_v61  ;;  %v1204_v14 = vmul.f32 %v1956_v35, %v1120_v10  ;;  %v1198_v15 = vadd.f32 %v1197_v11, %v1127_v28  ;;  %v73_v7 = vld [vmem:[%s2384_s5 + $0x8] sm:$0xff]  ;;  %v72_v8 = vld [vmem:[%s2384_s5] sm:$0xff] }
 0x41c   :  { %v1122_v18 = vpop.f32.mrf.mxu1  ;;  %v1199_v20 = vpop.f32.mrf.mxu0  ;;  %v75_v61 = vld [vmem:[%s2385_s6 + $0x8] sm:$0xff]  ;;  %v74_v10 = vld [vmem:[%s2385_s6] sm:$0xff] }
 0x41d   :  { %v1214_v43 = vadd.f32 %v1210_v12, %v1970_v54  ;;  %v1211_v22 = vmul.f32 %v1207_v13, %v1965_v46  ;;  %v1208_v60 = vadd.f32 %v1204_v14, %v1198_v15  ;;  %v1205_v23 = vmul.f32 %v1961_v40, %v1122_v18 }
 0x41e   :  { %v1200_v19 = vadd.f32 %v1199_v20, %v1128_v17 }
 0x41f   :  { %v1215_v25 = vadd.f32 %v1211_v22, %v1970_v54  ;;  %v1212_v16 = vmul.f32 %v1208_v60, %v1958_v36  ;;  %v1218_v62 = vmax.f32 %v1214_v43, 0.0 }
 0x420   :  { %v1209_v56 = vadd.f32 %v1205_v23, %v1200_v19 }
 0x421   :  { %v1219_v58 = vmax.f32 %v1215_v25, 0.0  ;;  %v1216_v63 = vadd.f32 %v1212_v16, %v1979_v6 }
 0x422   :  { %v1213_v2 = vmul.f32 %v1209_v56, %v1958_v36  ;;  %v1692_v36 = vld [vmem:[#allocation2] ss:$16 sps:$4 sm:$0xff]  }
 0x423   :  { %v1651_v26 = vpack.c.bf16 %v1219_v58, %v1218_v62  ;;  %v1220_v46 = vmax.f32 %v1216_v63, 0.0 }
 0x424   :  { %v1217_v27 = vadd.f32 %v1213_v2, %v1979_v6  ;;  %v1283_v6 = vpop.permute.xlu1 %1282 }
 0x425   :  { %1234 = vst [vmem:[#allocation2 + $0x4] sm:$0xff] %v1651_v26  ;;  %v1708_v45 = vpack.c.bf16 %v1220_v46, %v1218_v62 }
 0x426   :  { %v1221_v30 = vmax.f32 %v1217_v27, 0.0 }
 0x427   :  { %1278 = vrot.lane.b32.xlu1 %v1708_v45, %s1780_s19 }
 0x428   :  { %v1652_v37 = vpack.c.bf16 %v1221_v30, %v1220_v46  ;;  %v1707_v44 = vpack.c.bf16 %v1221_v30, %v1219_v58 }
 0x42a   :  { %1235 = vst [vmem:[#allocation2 + $0x14] sm:$0xff] %v1652_v37  ;;  %1280 = vrot.lane.b32.xlu0 %v1707_v44, %s1780_s19 }
 0x431   :  { %v1689_v54 = vld [vmem:[#allocation2 + $0x8] ss:$16 sps:$4 sm:$0xff]   ;;  %v1690_v48 = vld [vmem:[#allocation2 + $0x4] ss:$16 sps:$4 sm:$0xff]  }
 0x432   :  { %1261 = vrot.lane.b32.xlu1 %v1689_v54, %s1781_s20  ;;  %1259 = vrot.lane.b32.xlu0 %v1690_v48, %s1781_s20 }
 0x436   :  { %1369 = vrot.lane.b32.xlu1 %v1708_v45, %s1781_s20  ;;  %1257 = vrot.lane.b32.xlu0 %v1692_v36, %s1781_s20 }
 0x43a   :  { %1374 = vrot.lane.b32.xlu1 %v1708_v45, %s1781_s20  ;;  %1371 = vrot.lane.b32.xlu0 %v1707_v44, %s1781_s20 }
 0x43e   :  { %1378 = vrot.lane.b32.xlu1 %v2209_v42, %s1781_s20  ;;  %1376 = vrot.lane.b32.xlu0 %v1707_v44, %s1781_s20 }
 0x442   :  { %1290 = vrot.lane.b32.xlu1 %v1689_v54, %s1782_s21  ;;  %1288 = vrot.lane.b32.xlu0 %v1690_v48, %s1782_s21 }
 0x446   :  { %1384 = vrot.lane.b32.xlu1 %v1690_v48, %s1783_s22  ;;  %1286 = vrot.lane.b32.xlu0 %v1692_v36, %s1782_s21 }
 0x499   :  { %v1279_v4 = vpop.permute.xlu1 %1278 }
 0x49a   :  { %1394 = vrot.lane.b32.xlu1 %v1279_v4, %s1783_s22  ;;  %1298 = vrot.lane.b32.xlu0 %v1279_v4, %s1782_s21 }
 0x49c   :  { %v1281_v49 = vpop.permute.xlu0 %1280 }
 0x49d   :  { %v1285_v53 = vsel %vm188_vm2, %v1281_v49, %v1283_v6  ;;  %v1284_v39 = vsel %vm188_vm2, %v1279_v4, %v1281_v49 }
 0x4a4   :  { %v1262_v9 = vpop.permute.xlu1 %1261  ;;  %v1260_v33 = vpop.permute.xlu0 %1259 }
 0x4a5   :  { %1296 = vrot.lane.b32.xlu0 %v1262_v9, %s1782_s21  ;;  %v1264_v55 = vsel %vm166_vm3, %v1260_v33, %v1262_v9 }
 0x4a8   :  { %v1370_v42 = vpop.permute.xlu1 %1369  ;;  %v1258_v51 = vpop.permute.xlu0 %1257 }
 0x4a9   :  { %1471 = vrot.lane.b32.xlu0 %v1279_v4, %s1784_s23  ;;  %v1263_v57 = vsel %vm166_vm3, %v1258_v51, %v1260_v33 }
 0x4ac   :  { %v1375_v52 = vpop.permute.xlu1 %1374  ;;  %v1372_v38 = vpop.permute.xlu0 %1371 }
 0x4ad   :  { %1388 = vrot.lane.b32.xlu1 %v1375_v52, %s1783_s22  ;;  %1469 = vrot.lane.b32.xlu0 %v1372_v38, %s1784_s23  ;;  %v1373_v28 = vsel %vm166_vm3, %v1370_v42, %v1372_v38 }
 0x4b0   :  { %v1377_v59 = vpop.permute.xlu0 %1376  ;;  %v1379_v29 = vpop.permute.xlu1 %1378 }
 0x4b1   :  { %1302 = vrot.lane.b32.xlu1 %v1285_v53, %s1782_s21  ;;  %1465 = vrot.lane.b32.xlu0 %v1370_v42, %s1784_s23  ;;  %v1380_v1 = vsel %vm166_vm3, %v1375_v52, %v1377_v59  ;;  %v1381_v3 = vsel %vm166_vm3, %v1377_v59, %v1379_v29 }
 0x4b4   :  { %v1289_v11 = vpop.permute.xlu0 %1288  ;;  %v1291_v13 = vpop.permute.xlu1 %1290 }
 0x4b5   :  { %1294 = vrot.lane.b32.xlu1 %v1264_v55, %s1782_s21  ;;  %1300 = vrot.lane.b32.xlu0 %v1284_v39, %s1782_s21  ;;  %v1305_v26 = vsel %vm214_vm4, %v1289_v11, %v1291_v13 }
 0x4b8   :  { %v1287_v12 = vpop.permute.xlu0 %1286  ;;  %v1385_v15 = vpop.permute.xlu1 %1384 }
 0x4b9   :  { %1292 = vrot.lane.b32.xlu1 %v1263_v57, %s1782_s21  ;;  %1386 = vrot.lane.b32.xlu0 %v1689_v54, %s1783_s22  ;;  %v1304_v44 = vsel %vm214_vm4, %v1287_v12, %v1289_v11 }
 0x4bd   :  { %1396 = vrot.lane.b32.xlu1 %v1284_v39, %s1783_s22  ;;  %1398 = vrot.lane.b32.xlu0 %v1285_v53, %s1783_s22 }
 0x4c1   :  { %1473 = vrot.lane.b32.xlu1 %v1284_v39, %s1784_s23  ;;  %1475 = vrot.lane.b32.xlu0 %v1285_v53, %s1784_s23 }
 0x4c5   :  { %1390 = vrot.lane.b32.xlu1 %v1380_v1, %s1783_s22  ;;  %1392 = vrot.lane.b32.xlu0 %v1381_v3, %s1783_s22 }
 0x4c9   :  { %1467 = vrot.lane.b32.xlu1 %v1373_v28, %s1784_s23  ;;  %1463 = vrot.lane.b32.xlu0 %v1689_v54, %s1784_s23 }
 0x4cd   :  { %1461 = vrot.lane.b32.xlu1 %v1690_v48, %s1784_s23  ;;  %1459 = vrot.lane.b32.xlu0 %v1692_v36, %s1784_s23 }
 0x4d1   :  { %1382 = vrot.lane.b32.xlu1 %v1692_v36, %s1783_s22  ;;  %854 = vperm.xlu0 %1666, %v73_v7  }
 0x4d5   :  { %849 = vperm.xlu1 %1667, %v72_v8   ;;  %868 = vperm.xlu0 %1666, %v75_v61  }
 0x4d9   :  { %863 = vperm.xlu1 %1667, %v74_v10  }
 0x50c   :  { %v1299_v14 = vpop.permute.xlu0 %1298  ;;  %v1395_v18 = vpop.permute.xlu1 %1394 }
 0x517   :  { %v1297_v17 = vpop.permute.xlu0 %1296 }
 0x51b   :  { %v1472_v20 = vpop.permute.xlu0 %1471 }
 0x51f   :  { %v1389_v43 = vpop.permute.xlu1 %1388  ;;  %v1470_v22 = vpop.permute.xlu0 %1469 }
 0x523   :  { %v1303_v60 = vpop.permute.xlu1 %1302  ;;  %v1466_v23 = vpop.permute.xlu0 %1465 }
 0x527   :  { %v1295_v19 = vpop.permute.xlu1 %1294  ;;  %v1301_v25 = vpop.permute.xlu0 %1300 }
 0x528   :  { %v1308_v16 = vsel %vm214_vm4, %v1299_v14, %v1301_v25  ;;  %v1309_v56 = vsel %vm214_vm4, %v1301_v25, %v1303_v60  ;;  %v1307_v62 = vsel %vm214_vm4, %v1295_v19, %v1297_v17  ;;  %v1696_v17 = vld [vmem:[%s2379_s0 + $0x8] sm:$0xff] }
 0x529   :  { %1326 = vmatprep.subr.bf16.mxu1 %v1309_v56 }
 0x52a   :  { %1327 = vmatpush1.bf16.msra.mxu1 %v1308_v16 }
 0x52b   :  { %v1293_v58 = vpop.permute.xlu1 %1292  ;;  %v1387_v63 = vpop.permute.xlu0 %1386  ;;  %1328 = vmatprep.subr.bf16.mxu1 %v1307_v62 }
 0x52c   :  { %v1306_v2 = vsel %vm214_vm4, %v1293_v58, %v1295_v19  ;;  %v1401_v33 = vsel %vm320_vm5, %v1385_v15, %v1387_v63 }
 0x52e   :  { %1329 = vmatpush1.bf16.msra.mxu1 %v1306_v2 }
 0x52f   :  { %v1397_v27 = vpop.permute.xlu1 %1396  ;;  %v1399_v46 = vpop.permute.xlu0 %1398  ;;  %1330 = vmatprep.subr.bf16.mxu1 %v1305_v26 }
 0x530   :  { %v1404_v30 = vsel %vm320_vm5, %v1395_v18, %v1397_v27  ;;  %v1405_v37 = vsel %vm320_vm5, %v1397_v27, %v1399_v46 }
 0x531   :  { %1422 = vmatprep.subr.bf16.mxu0 %v1405_v37 }
 0x532   :  { %1331 = vmatpush1.bf16.msra.mxu1 %v1304_v44  ;;  %1423 = vmatpush1.bf16.msra.mxu0 %v1404_v30 }
 0x533   :  { %v1474_v45 = vpop.permute.xlu1 %1473  ;;  %v1476_v54 = vpop.permute.xlu0 %1475 }
 0x534   :  { %v1481_v48 = vsel %vm406_vm6, %v1472_v20, %v1474_v45  ;;  %v1482_v36 = vsel %vm406_vm6, %v1474_v45, %v1476_v54 }
 0x535   :  { %1499 = vmatprep.subr.bf16.mxu1 %v1482_v36  ;;  %1640 = vmatmul.mubr.msk.bf16.vlgmr.msra.gmra.mxu1 %vm227_vm7, %v2157_v24 }
 0x536   :  { %1500 = vmatpush1.bf16.msra.mxu1 %v1481_v48  ;;  %1521 = vmatprep.mubr.bf16.mxu1 %v1779_v0 }
 0x537   :  { %v1391_v6 = vpop.permute.xlu1 %1390  ;;  %v1393_v4 = vpop.permute.xlu0 %1392 }
 0x538   :  { %v1402_v49 = vsel %vm320_vm5, %v1389_v43, %v1391_v6  ;;  %v1403_v9 = vsel %vm320_vm5, %v1391_v6, %v1393_v4 }
 0x539   :  { %1424 = vmatprep.subr.bf16.mxu0 %v1403_v9 }
 0x53a   :  { %1425 = vmatpush1.bf16.msra.mxu0 %v1402_v49 }
 0x53b   :  { %v1468_v42 = vpop.permute.xlu1 %1467  ;;  %v1464_v51 = vpop.permute.xlu0 %1463  ;;  %1426 = vmatprep.subr.bf16.mxu0 %v1401_v33 }
 0x53c   :  { %v1479_v52 = vsel %vm406_vm6, %v1466_v23, %v1468_v42  ;;  %v1480_v24 = vsel %vm406_vm6, %v1468_v42, %v1470_v22 }
 0x53d   :  { %1501 = vmatprep.subr.bf16.mxu1 %v1480_v24  ;;  %v1697_v24 = vld [vmem:[%s2379_s0 + $0x20] sm:$0xff] }
 0x53e   :  { %1502 = vmatpush1.bf16.msra.mxu1 %v1479_v52 }
 0x53f   :  { %v1462_v38 = vpop.permute.xlu1 %1461  ;;  %v1460_v0 = vpop.permute.xlu0 %1459 }
 0x540   :  { %v1478_v53 = vsel %vm406_vm6, %v1462_v38, %v1464_v51  ;;  %v1477_v55 = vsel %vm406_vm6, %v1460_v0, %v1462_v38 }
 0x541   :  { %1503 = vmatprep.subr.bf16.mxu1 %v1478_v53 }
 0x542   :  { %1504 = vmatpush1.bf16.msra.mxu1 %v1477_v55 }
 0x543   :  { %v1383_v39 = vpop.permute.xlu1 %1382 }
 0x544   :  { %v1400_v57 = vsel %vm320_vm5, %v1383_v39, %v1385_v15 }
 0x545   :  { %1427 = vmatpush1.bf16.msra.mxu0 %v1400_v57  ;;  %1644 = vmatmul.mubr.msk.bf16.vlgmr.msra.gmra.mxu1 %vm227_vm7, %v2174_v41 }
 0x548   :  { %1643 = vmatmul.mubr.msk.bf16.vlgmr.msra.gmra.mxu0 %vm227_vm7, %v2151_v21  ;;  %v1693_v21 = vld [vmem:[%s2379_s0 + $0x10] sm:$0xff] }
 0x54c   :  { %v2327_v59 = vpop.permute.xlu0 %854 }
 0x54d   :  { %v859_v29 = vmul.f32 %v2327_v59, %v2225_v5  ;;  %v860_v1 = vmul.f32 %v2327_v59, %v2227_v50  ;;  %v1694_v5 = vld [vmem:[%s2379_s0 + $0x18] sm:$0xff] }
 0x550   :  { %v850_v3 = vpop.permute.xlu1 %849  ;;  %v2333_v28 = vpop.permute.xlu0 %868 }
 0x551   :  { %v873_v7 = vadd.f32 %v2333_v28, %v859_v29  ;;  %v874_v8 = vadd.f32 %v2333_v28, %v860_v1  ;;  %v857_v41 = vmul.f32 %v850_v3, %v2219_v31  ;;  %v858_v61 = vmul.f32 %v850_v3, %v2222_v47  ;;  %v1695_v31 = vld [vmem:[%s2379_s0] sm:$0xff]  ;;  %v1699_v1 = vld [vmem:[%s2379_s0 + $0x30] sm:$0xff] }
 0x553   :  { %v877_v10 = vadd.f32 %v1693_v21, %v873_v7  ;;  %v878_v50 = vadd.f32 %v1694_v5, %v874_v8 }
 0x554   :  { %v864_v11 = vpop.permute.xlu1 %863 }
 0x555   :  { %v871_v12 = vadd.f32 %v864_v11, %v857_v41  ;;  %v872_v13 = vadd.f32 %v864_v11, %v858_v61  ;;  %v881_v14 = vmax.f32 %v877_v10, 0.0  ;;  %v882_v15 = vmax.f32 %v878_v50, 0.0  ;;  %v1700_v41 = vld [vmem:[%s2379_s0 + $0x38] sm:$0xff] }
 0x557   :  { %v875_v47 = vadd.f32 %v1695_v31, %v871_v12  ;;  %v876_v18 = vadd.f32 %v1696_v17, %v872_v13  ;;  %885 = vst [vmem:[#allocation8 + $0x10] sm:$0xff] %v881_v14  ;;  %886 = vst [vmem:[#allocation8 + $0x18] sm:$0xff] %v882_v15 }
 0x559   :  { %v879_v20 = vmax.f32 %v875_v47, 0.0  ;;  %v880_v43 = vmax.f32 %v876_v18, 0.0 }
 0x55b   :  { %883 = vst [vmem:[#allocation8] sm:$0xff] %v879_v20  ;;  %884 = vst [vmem:[#allocation8 + $0x8] sm:$0xff] %v880_v43 }
 0x5f5   :  { %v1350_v22 = vpop.f32.mrf.mxu1 }
 0x5f6   :  { %v1455_v16 = vmul.f32 %v1952_v32, %v1350_v22 }
 0x5f7   :  { %v1352_v60 = vpop.f32.mrf.mxu1 }
 0x5f8   :  { %v1456_v58 = vmul.f32 %v1954_v34, %v1352_v60 }
 0x5f9   :  { %v1354_v23 = vpop.f32.mrf.mxu1 }
 0x5fa   :  { %v1457_v46 = vmul.f32 %v1952_v32, %v1354_v23 }
 0x5fb   :  { %v1356_v19 = vpop.f32.mrf.mxu1 }
 0x5fc   :  { %v1458_v54 = vmul.f32 %v1954_v34, %v1356_v19 }
 0x605   :  { %v1523_v25 = vpop.f32.mrf.mxu1 }
 0x606   :  { %v1524_v63 = vadd.f32 %v1523_v25, %v1455_v16 }
 0x607   :  { %v1525_v56 = vpop.f32.mrf.mxu1 }
 0x608   :  { %v1446_v62 = vpop.f32.mrf.mxu0  ;;  %v1526_v30 = vadd.f32 %v1525_v56, %v1456_v58 }
 0x609   :  { %v1532_v2 = vmul.f32 %v1956_v35, %v1446_v62  ;;  %v1527_v26 = vpop.f32.mrf.mxu1 }
 0x60a   :  { %v1448_v27 = vpop.f32.mrf.mxu0  ;;  %v1528_v6 = vadd.f32 %v1527_v26, %v1457_v46 }
 0x60b   :  { %v1536_v37 = vadd.f32 %v1532_v2, %v1524_v63  ;;  %v1533_v44 = vmul.f32 %v1961_v40, %v1448_v27  ;;  %v1529_v45 = vpop.f32.mrf.mxu1 }
 0x60c   :  { %v1450_v48 = vpop.f32.mrf.mxu0  ;;  %v1530_v9 = vadd.f32 %v1529_v45, %v1458_v54 }
 0x60d   :  { %v1540_v36 = vmul.f32 %v1536_v37, %v850_v3  ;;  %v1537_v4 = vadd.f32 %v1533_v44, %v1526_v30  ;;  %v1534_v49 = vmul.f32 %v1956_v35, %v1450_v48  ;;  %v1698_v35 = vld [vmem:[%s2379_s0 + $0x28] sm:$0xff] }
 0x60e   :  { %v1452_v33 = vpop.f32.mrf.mxu0 }
 0x60f   :  { %v1544_v42 = vadd.f32 %v1540_v36, %v864_v11  ;;  %v1541_v51 = vmul.f32 %v1537_v4, %v850_v3  ;;  %v1538_v52 = vadd.f32 %v1534_v49, %v1528_v6  ;;  %v1535_v32 = vmul.f32 %v1961_v40, %v1452_v33 }
 0x611   :  { %v1548_v38 = vadd.f32 %v1697_v24, %v1544_v42  ;;  %v1545_v0 = vadd.f32 %v1541_v51, %v864_v11  ;;  %v1542_v34 = vmul.f32 %v1538_v52, %v2327_v59  ;;  %v1539_v53 = vadd.f32 %v1535_v32, %v1530_v9 }
 0x613   :  { %v1552_v55 = vmax.f32 %v1548_v38, 0.0  ;;  %v1549_v39 = vadd.f32 %v1698_v35, %v1545_v0  ;;  %v1546_v57 = vadd.f32 %v1542_v34, %v2333_v28  ;;  %v1543_v29 = vmul.f32 %v1539_v53, %v2327_v59 }
 0x615   :  { %1557 = vst [vmem:[#allocation8 + $0x20] sm:$0xff] %v1552_v55  ;;  %v1553_v40 = vmax.f32 %v1549_v39, 0.0  ;;  %v1550_v3 = vadd.f32 %v1699_v1, %v1546_v57  ;;  %v1547_v7 = vadd.f32 %v1543_v29, %v2333_v28 }
 0x617   :  { %1558 = vst [vmem:[#allocation8 + $0x28] sm:$0xff] %v1553_v40  ;;  %v1554_v8 = vmax.f32 %v1550_v3, 0.0  ;;  %v1551_v61 = vadd.f32 %v1700_v41, %v1547_v7 }
 0x619   :  { %1559 = vst [vmem:[#allocation8 + $0x30] sm:$0xff] %v1554_v8  ;;  %v1555_v59 = vmax.f32 %v1551_v61, 0.0 }
 0x61b   :  { %1560 = vst [vmem:[#allocation8 + $0x38] sm:$0xff] %v1555_v59 }
 0x61c   :  { %1760 = shalt.err (!%p1757_p0)
}
 0x61d   :  { %s1787_s4 = smov 256  }
 0x61e   :  { %1572 = dma.vmem_to_hbm [thread:$0]  %s1567_s10, 1024, %s2386_s7, [#allocation5], %s1787_s4, %s1787_s4, %s1784_s23  }
 0x61f   :  { %1773 = dma.done.wait [#allocation5], 1024  }
 0x620   :  { %1774 = vsyncadd [#allocation5], 4294966272 }
 0x621   :  { %1576 = vsyncpa [#allocation4], 1 }
 0x622   :  { %1577 = vsyncpa [#allocation7], 1 }
 0x623   :  { %1578 = vsyncpa [#allocation5], 1 }

</bundles_post_ra>
